<compile_context>
chip_gen: v7x
topology: tpu7x:2x2x1
jax: 0.10.0
libtpu: 0.0.40
codegen_flags: <defaults>
</compile_context>

<pallas_src>
import functools
import jax
import jax.numpy as jnp
from jax import lax
from jax.experimental import pallas as pl
from jax.experimental.pallas import tpu as pltpu


# ----------------------------- kernel helpers -----------------------------

def _layernorm(x, gamma, beta, eps=1e-5):
    mu = jnp.mean(x, axis=-1, keepdims=True)
    var = jnp.mean((x - mu) ** 2, axis=-1, keepdims=True)
    return (x - mu) * lax.rsqrt(var + eps) * gamma + beta


def _gelu(x):
    # tanh-approximate GELU (PyTorch nn.GELU default is erf-exact; difference < 1e-3)
    c = 0.7978845608028654  # sqrt(2/pi)
    return 0.5 * x * (1.0 + jnp.tanh(c * (x + 0.044715 * x * x * x)))


# ------------------------------ Pallas kernel ------------------------------

def encoder_layer_kernel(xq_ref, xf_ref, mask_ref,
                         ln1_g_ref, ln1_b_ref,
                         wq_ref, bq_ref, wkv_ref, bkv_ref,
                         wo_ref, bo_ref,
                         ln2_g_ref, ln2_b_ref,
                         w1_ref, b1_ref, w2_ref, b2_ref,
                         out_ref, attnw_ref,
                         k_scr, v_scr, o_scr, aw_scr,
                         *, num_heads):
    qi = pl.program_id(1)
    TQ = xq_ref.shape[1]
    S = xf_ref.shape[1]
    D = xq_ref.shape[2]
    hd = D // num_heads
    scale = 1.0 / float(hd) ** 0.5
    bf16 = jnp.bfloat16
    f32 = jnp.float32

    # --- K/V projection for the whole (padded) sequence: once per batch row (first query tile),
    #     fused K|V matmul, K cached PRE-TRANSPOSED as (D, S), V as (S, D), both bf16. ---
    @pl.when(qi == 0)
    def _():
        xf = xf_ref[0].astype(f32)                                          # bf16 in HBM, LN in f32
        xfn = _layernorm(xf, ln1_g_ref[...], ln1_b_ref[...]).astype(bf16)
        kv = jnp.dot(xfn, wkv_ref[...],
                     preferred_element_type=f32) + bkv_ref[...]             # (S, 2D) f32
        # one 2-D transpose per batch row -> every per-tile QK^T is a canonical matmul
        k_scr[...] = jnp.transpose(kv[:, :D]).astype(bf16)                  # (D, S)
        v_scr[...] = kv[:, D:].astype(bf16)                                 # (S, D), no transpose

    # --- per query-tile work ---
    xq = xq_ref[0]                                                          # (TQ, D) f32
    xqn = _layernorm(xq, ln1_g_ref[...], ln1_b_ref[...])
    q = jnp.dot(xqn.astype(bf16), wq_ref[...],
                preferred_element_type=f32) + bq_ref[...]                   # (TQ, D) f32
    qb = q.astype(bf16)
    mask = mask_ref[0]                                                      # (1, S) additive mask

    aw_scr[...] = jnp.zeros_like(aw_scr)

    # Stream attention one head at a time: caps the live score/softmax temporary at (TQ, S) f32
    # (review item: avoid a single (H, TQ, S) tensor).  All slices are static and hd-aligned, so
    # no dynamic lane-offset relayouts; each head is one (TQ,hd)@(hd,S) + (TQ,S)@(S,hd) MXU pass.
    for h in range(num_heads):
        lo = h * hd
        q_h = qb[:, lo:lo + hd]                                             # (TQ, hd) bf16
        kT_h = k_scr[lo:lo + hd, :]                                         # (hd, S)  bf16
        s = jnp.dot(q_h, kT_h, preferred_element_type=f32) * scale + mask   # (TQ, S)  f32
        s = s - jnp.max(s, axis=-1, keepdims=True)
        e = jnp.exp(s)
        # approx reciprocal (EUP slot); rows sum to 1 within ~1e-3 — fine at bf16 output precision
        p = e * pl.reciprocal(jnp.sum(e, axis=-1, keepdims=True), approx=True)
        aw_scr[...] += p
        v_h = v_scr[:, lo:lo + hd]                                          # (S, hd) bf16
        o_scr[:, lo:lo + hd] = jnp.dot(p.astype(bf16), v_h,
                                       preferred_element_type=f32)          # (TQ, hd) f32

    # head-averaged attention weights, streamed straight into the (bf16) output block
    attnw_ref[0] = (aw_scr[...] * (1.0 / float(num_heads))).astype(attnw_ref.dtype)

    # output projection (o_scr is already (TQ, D): no transpose / reshape needed)
    attn_out = jnp.dot(o_scr[...].astype(bf16), wo_ref[...],
                       preferred_element_type=f32) + bo_ref[...]

    # residual
    x2 = xq + attn_out

    # --- Pre-LN 2 + FFN (no trailing residual, matching the reference forward) ---
    xn2 = _layernorm(x2, ln2_g_ref[...], ln2_b_ref[...])
    h1 = _gelu(jnp.dot(xn2.astype(bf16), w1_ref[...],
                       preferred_element_type=f32) + b1_ref[...])
    y = jnp.dot(h1.astype(bf16), w2_ref[...],
                preferred_element_type=f32) + b2_ref[...]

    out_ref[0] = y


# -------------------------------- wrapper ----------------------------------

def _tpu_defaults():
    """(query-tile size, vmem_limit_bytes) chosen per TPU generation."""
    try:
        kind = jax.devices()[0].device_kind.lower()
    except Exception:
        kind = ""
    if "v7" in kind:       # 64 MiB physical VMEM: small tiles, conservative limit
        return 128, 48 * 1024 * 1024
    if "v6" in kind:       # 128 MiB VMEM: big tiles amortize per-grid-step overhead
        return 512, 100 * 1024 * 1024
    if "v5" in kind:       # 128 MiB VMEM but 128-wide MXU / 1 vst slot
        return 256, 100 * 1024 * 1024
    return 256, 64 * 1024 * 1024


def encoder_layer(x, key_padding_mask, params, num_heads, *,
                  tq=None, attn_weights_dtype=jnp.bfloat16,
                  vmem_limit_bytes=None, single_buffer_weights=False):
    """x: (B, S, D) f32, key_padding_mask: (B, S) bool (True = padded) or None."""
    B, S, D = x.shape
    assert D % num_heads == 0
    hd = D // num_heads
    d_ff = params["w1"].shape[1]
    bf16 = jnp.bfloat16

    dflt_tq, dflt_vmem = _tpu_defaults()
    tq = dflt_tq if tq is None else tq
    vmem_limit_bytes = dflt_vmem if vmem_limit_bytes is None else vmem_limit_bytes

    if key_padding_mask is None:
        key_padding_mask = jnp.zeros((B, S), dtype=bool)

    # Pad S up to the tile size (padded keys masked out) instead of the old TQ = S fallback.
    S_in = S
    if S >= tq:
        TQ = tq
        S_pad = ((S + TQ - 1) // TQ) * TQ
    else:
        S_pad = ((S + 7) // 8) * 8
        TQ = S_pad
    if S_pad != S:
        x = jnp.pad(x, ((0, 0), (0, S_pad - S), (0, 0)))
        key_padding_mask = jnp.pad(key_padding_mask, ((0, 0), (0, S_pad - S)),
                                   constant_values=True)
    NQ = S_pad // TQ

    # additive key-padding mask, shaped (B, 1, S_pad) so the per-batch block is (1, 1, S_pad)
    add_mask = jnp.where(key_padding_mask, -1e9, 0.0).astype(jnp.float32)[:, None, :]

    wqkv, bqkv = params["wqkv"], params["bqkv"]
    wq = wqkv[:, :D].astype(bf16)
    wkv = wqkv[:, D:].astype(bf16)        # fused K|V projection weight (D, 2D)
    bq = bqkv[:, :D]
    bkv = bqkv[:, D:]

    xf = x.astype(bf16)                   # full-sequence view only feeds the bf16 K/V matmul

    in_arrays = [
        x, xf, add_mask,
        params["ln1_g"], params["ln1_b"],
        wq, bq, wkv, bkv,
        params["wo"].astype(bf16), params["bo"],
        params["ln2_g"], params["ln2_b"],
        params["w1"].astype(bf16), params["b1"],
        params["w2"].astype(bf16), params["b2"],
    ]

    # Grid-invariant weights/biases: constant index_map keeps them VMEM-resident across the grid.
    # single_buffer_weights=True additionally requests 1-deep buffering (frees ~half the weight
    # VMEM; needed to fit v7x's 64 MiB at D=1024/d_ff=4096).
    def const_spec(a):
        nd = a.ndim
        if single_buffer_weights:
            return pl.BlockSpec(a.shape, lambda b, qi, _n=nd: (0,) * _n,
                                pipeline_mode=pl.Buffered(1))
        return pl.BlockSpec(a.shape, lambda b, qi, _n=nd: (0,) * _n)

    in_specs = [
        pl.BlockSpec((1, TQ, D), lambda b, qi: (b, qi, 0)),      # query tile of x (f32, residual)
        pl.BlockSpec((1, S_pad, D), lambda b, qi: (b, 0, 0)),    # full-sequence x (bf16, K/V proj)
        pl.BlockSpec((1, 1, S_pad), lambda b, qi: (b, 0, 0)),    # additive key-padding mask
    ] + [const_spec(a) for a in in_arrays[3:]]

    out_shape = (jax.ShapeDtypeStruct((B, S_pad, D), jnp.float32),
                 jax.ShapeDtypeStruct((B, S_pad, S_pad), attn_weights_dtype))
    out_specs = (pl.BlockSpec((1, TQ, D), lambda b, qi: (b, qi, 0)),
                 pl.BlockSpec((1, TQ, S_pad), lambda b, qi: (b, qi, 0)))

    attnw_bytes = jnp.dtype(attn_weights_dtype).itemsize
    flops = 2 * B * S_pad * (4 * D * D + 2 * S_pad * D + 2 * D * d_ff)
    transcendentals = B * S_pad * (num_heads * S_pad + d_ff)
    bytes_accessed = (B * S_pad * D * (4 + 2 + 4)                      # xq f32 + xf bf16 + out f32
                      + B * S_pad * S_pad * attnw_bytes                # attention weights
                      + 2 * (3 * D * D + 2 * D * d_ff))                # bf16 weights

    y, attn_w = pl.pallas_call(
        functools.partial(encoder_layer_kernel, num_heads=num_heads),
        out_shape=out_shape,
        grid=(B, NQ),
        in_specs=in_specs,
        out_specs=out_specs,
        scratch_shapes=[
            pltpu.VMEM((D, S_pad), bf16),          # K cache, pre-transposed (K^T)
            pltpu.VMEM((S_pad, D), bf16),          # V cache
            pltpu.VMEM((TQ, D), jnp.float32),      # per-tile attention-output accumulator
            pltpu.VMEM((TQ, S_pad), jnp.float32),  # head-summed attention-weight accumulator
        ],
        compiler_params=pltpu.CompilerParams(
            dimension_semantics=("parallel", "arbitrary"),
            vmem_limit_bytes=vmem_limit_bytes),
        cost_estimate=pl.CostEstimate(flops=flops,
                                      transcendentals=transcendentals,
                                      bytes_accessed=bytes_accessed),
    )(*in_arrays)

    if S_pad != S_in:
        y = y[:, :S_in, :]
        attn_w = attn_w[:, :S_in, :S_in]
    return y, attn_w


# --------------------------- pure-JAX reference -----------------------------

def encoder_layer_ref(x, key_padding_mask, params, num_heads):
    B, S, D = x.shape
    hd = D // num_heads

    def ln(v, g, b, eps=1e-5):
        mu = jnp.mean(v, -1, keepdims=True)
        var = jnp.mean((v - mu) ** 2, -1, keepdims=True)
        return (v - mu) / jnp.sqrt(var + eps) * g + b

    xn = ln(x, params["ln1_g"][0], params["ln1_b"][0])
    qkv = xn @ params["wqkv"] + params["bqkv"][0]
    q, k, v = qkv[..., :D], qkv[..., D:2 * D], qkv[..., 2 * D:]
    q = q.reshape(B, S, num_heads, hd).transpose(0, 2, 1, 3)
    k = k.reshape(B, S, num_heads, hd).transpose(0, 2, 1, 3)
    v = v.reshape(B, S, num_heads, hd).transpose(0, 2, 1, 3)
    s = jnp.einsum("bhqd,bhkd->bhqk", q, k) / jnp.sqrt(hd)
    s = s + jnp.where(key_padding_mask, -1e9, 0.0)[:, None, None, :]
    p = jax.nn.softmax(s, axis=-1)
    o = jnp.einsum("bhqk,bhkd->bhqd", p, v).transpose(0, 2, 1, 3).reshape(B, S, D)
    attn_out = o @ params["wo"] + params["bo"][0]
    x2 = x + attn_out
    xn2 = ln(x2, params["ln2_g"][0], params["ln2_b"][0])
    c = 0.7978845608028654
    h1p = xn2 @ params["w1"] + params["b1"][0]
    h1 = 0.5 * h1p * (1.0 + jnp.tanh(c * (h1p + 0.044715 * h1p ** 3)))
    y = h1 @ params["w2"] + params["b2"][0]
    return y, jnp.mean(p, axis=1)


# ---------------------------------- main ------------------------------------

if __name__ == "__main__":
    B, S, D, H, D_FF = 2, 8, 32, 4, 64

    key = jax.random.PRNGKey(0)
    ks = jax.random.split(key, 10)
    init = lambda k, shape: (0.02 * jax.random.normal(k, shape)).astype(jnp.float32)

    params = {
        "ln1_g": jnp.ones((1, D), jnp.float32),
        "ln1_b": jnp.zeros((1, D), jnp.float32),
        "wqkv": init(ks[0], (D, 3 * D)),       # pre-transposed: xn @ wqkv
        "bqkv": init(ks[1], (1, 3 * D)),
        "wo":   init(ks[2], (D, D)),
        "bo":   init(ks[3], (1, D)),
        "ln2_g": jnp.ones((1, D), jnp.float32),
        "ln2_b": jnp.zeros((1, D), jnp.float32),
        "w1":   init(ks[4], (D, D_FF)),
        "b1":   init(ks[5], (1, D_FF)),
        "w2":   init(ks[6], (D_FF, D)),
        "b2":   init(ks[7], (1, D)),
    }

    x = jax.random.normal(ks[8], (B, S, D), dtype=jnp.float32)
    # batch 0: no padding; batch 1: last two positions padded
    key_padding_mask = jnp.array(
        [[False] * S, [False] * (S - 2) + [True, True]], dtype=bool)

    out, attn_w = encoder_layer(x, key_padding_mask, params, H)
    out = jax.block_until_ready(out)
    attn_w = jax.block_until_ready(attn_w)

    ref_out, ref_attn = encoder_layer_ref(x, key_padding_mask, params, H)
    assert out.shape == (B, S, D) and attn_w.shape == (B, S, S)
    assert jnp.allclose(out, ref_out, atol=2e-2, rtol=2e-2), \
        float(jnp.max(jnp.abs(out - ref_out)))
    assert jnp.allclose(attn_w.astype(jnp.float32), ref_attn, atol=2e-2, rtol=2e-2), \
        float(jnp.max(jnp.abs(attn_w.astype(jnp.float32) - ref_attn)))

    print("KERNEL_OK")
</pallas_src>

<mosaic_0001>
module attributes {stable_mosaic.version = 11 : i64} {
  func.func @encoder_layer_kernel(%arg0: i32, %arg1: i32, %arg2: memref<1x8x32xf32, #tpu.memory_space<vmem>>, %arg3: memref<1x8x32xbf16, #tpu.memory_space<vmem>>, %arg4: memref<1x1x8xf32, #tpu.memory_space<vmem>>, %arg5: memref<1x32xf32, #tpu.memory_space<vmem>>, %arg6: memref<1x32xf32, #tpu.memory_space<vmem>>, %arg7: memref<32x32xbf16, #tpu.memory_space<vmem>>, %arg8: memref<1x32xf32, #tpu.memory_space<vmem>>, %arg9: memref<32x64xbf16, #tpu.memory_space<vmem>>, %arg10: memref<1x64xf32, #tpu.memory_space<vmem>>, %arg11: memref<32x32xbf16, #tpu.memory_space<vmem>>, %arg12: memref<1x32xf32, #tpu.memory_space<vmem>>, %arg13: memref<1x32xf32, #tpu.memory_space<vmem>>, %arg14: memref<1x32xf32, #tpu.memory_space<vmem>>, %arg15: memref<32x64xbf16, #tpu.memory_space<vmem>>, %arg16: memref<1x64xf32, #tpu.memory_space<vmem>>, %arg17: memref<64x32xbf16, #tpu.memory_space<vmem>>, %arg18: memref<1x32xf32, #tpu.memory_space<vmem>>, %arg19: memref<1x8x32xf32, #tpu.memory_space<vmem>>, %arg20: memref<1x8x8xbf16, #tpu.memory_space<vmem>>, %arg21: memref<32x8xbf16, #tpu.memory_space<vmem>>, %arg22: memref<8x32xbf16, #tpu.memory_space<vmem>>, %arg23: memref<8x32xf32, #tpu.memory_space<vmem>>, %arg24: memref<8x8xf32, #tpu.memory_space<vmem>>) attributes {dimension_semantics = [#tpu.dimension_semantics<parallel>, #tpu.dimension_semantics<arbitrary>], iteration_bounds = array<i64: 2, 1>, scalar_prefetch = 0 : i64, scratch_operands = 4 : i64, tpu.core_type = #tpu.core_type<tc>, window_params = [{transform_indices = @transform_0, window_bounds = array<i64: 1, 8, 32>}, {transform_indices = @transform_1, window_bounds = array<i64: 1, 8, 32>}, {transform_indices = @transform_2, window_bounds = array<i64: 1, 1, 8>}, {pipeline_mode = #tpu.pipeline_mode<synchronous>, transform_indices = @transform_3, window_bounds = array<i64: 1, 32>}, {pipeline_mode = #tpu.pipeline_mode<synchronous>, transform_indices = @transform_4, window_bounds = array<i64: 1, 32>}, {pipeline_mode = #tpu.pipeline_mode<synchronous>, transform_indices = @transform_5, window_bounds = array<i64: 32, 32>}, {pipeline_mode = #tpu.pipeline_mode<synchronous>, transform_indices = @transform_6, window_bounds = array<i64: 1, 32>}, {pipeline_mode = #tpu.pipeline_mode<synchronous>, transform_indices = @transform_7, window_bounds = array<i64: 32, 64>}, {pipeline_mode = #tpu.pipeline_mode<synchronous>, transform_indices = @transform_8, window_bounds = array<i64: 1, 64>}, {pipeline_mode = #tpu.pipeline_mode<synchronous>, transform_indices = @transform_9, window_bounds = array<i64: 32, 32>}, {pipeline_mode = #tpu.pipeline_mode<synchronous>, transform_indices = @transform_10, window_bounds = array<i64: 1, 32>}, {pipeline_mode = #tpu.pipeline_mode<synchronous>, transform_indices = @transform_11, window_bounds = array<i64: 1, 32>}, {pipeline_mode = #tpu.pipeline_mode<synchronous>, transform_indices = @transform_12, window_bounds = array<i64: 1, 32>}, {pipeline_mode = #tpu.pipeline_mode<synchronous>, transform_indices = @transform_13, window_bounds = array<i64: 32, 64>}, {pipeline_mode = #tpu.pipeline_mode<synchronous>, transform_indices = @transform_14, window_bounds = array<i64: 1, 64>}, {pipeline_mode = #tpu.pipeline_mode<synchronous>, transform_indices = @transform_15, window_bounds = array<i64: 64, 32>}, {pipeline_mode = #tpu.pipeline_mode<synchronous>, transform_indices = @transform_16, window_bounds = array<i64: 1, 32>}, {transform_indices = @transform_17, window_bounds = array<i64: 1, 8, 32>}, {transform_indices = @transform_18, window_bounds = array<i64: 1, 8, 8>}]} {
    %c0_i32 = arith.constant 0 : i32
    %0 = arith.cmpi eq, %arg1, %c0_i32 : i32
    %1 = arith.extui %0 : i1 to i32
    %c0_i32_0 = arith.constant 0 : i32
    %2 = arith.cmpi ne, %1, %c0_i32_0 : i32
    scf.if %2 {
      %c0_118 = arith.constant 0 : index
      %c0_119 = arith.constant 0 : index
      %c0_120 = arith.constant 0 : index
      %203 = vector.load %arg3[%c0_118, %c0_119, %c0_120] : memref<1x8x32xbf16, #tpu.memory_space<vmem>>, vector<1x8x32xbf16>
      %204 = vector.shape_cast %203 : vector<1x8x32xbf16> to vector<8x32xbf16>
      %205 = arith.extf %204 : vector<8x32xbf16> to vector<8x32xf32>
      %c0_121 = arith.constant 0 : index
      %c0_122 = arith.constant 0 : index
      %206 = vector.load %arg5[%c0_121, %c0_122] : memref<1x32xf32, #tpu.memory_space<vmem>>, vector<1x32xf32>
      %c0_123 = arith.constant 0 : index
      %c0_124 = arith.constant 0 : index
      %207 = vector.load %arg6[%c0_123, %c0_124] : memref<1x32xf32, #tpu.memory_space<vmem>>, vector<1x32xf32>
      %cst_125 = arith.constant dense<0.000000e+00> : vector<8xf32>
      %208 = vector.multi_reduction <add>, %205, %cst_125 [1] : vector<8x32xf32> to vector<8xf32>
      %209 = vector.shape_cast %208 : vector<8xf32> to vector<8x1xf32>
      %cst_126 = arith.constant 3.200000e+01 : f32
      %210 = vector.broadcast %cst_126 : f32 to vector<8x1xf32>
      %211 = arith.divf %209, %210 : vector<8x1xf32>
      %212 = vector.broadcast %211 : vector<8x1xf32> to vector<8x32xf32>
      %213 = arith.subf %205, %212 : vector<8x32xf32>
      %214 = arith.mulf %213, %213 : vector<8x32xf32>
      %cst_127 = arith.constant dense<0.000000e+00> : vector<8xf32>
      %215 = vector.multi_reduction <add>, %214, %cst_127 [1] : vector<8x32xf32> to vector<8xf32>
      %216 = vector.shape_cast %215 : vector<8xf32> to vector<8x1xf32>
      %cst_128 = arith.constant 3.200000e+01 : f32
      %217 = vector.broadcast %cst_128 : f32 to vector<8x1xf32>
      %218 = arith.divf %216, %217 : vector<8x1xf32>
      %219 = vector.broadcast %211 : vector<8x1xf32> to vector<8x32xf32>
      %220 = arith.subf %205, %219 : vector<8x32xf32>
      %cst_129 = arith.constant 9.99999974E-6 : f32
      %221 = vector.broadcast %cst_129 : f32 to vector<8x1xf32>
      %222 = arith.addf %218, %221 : vector<8x1xf32>
      %223 = math.rsqrt %222 : vector<8x1xf32>
      %224 = vector.broadcast %223 : vector<8x1xf32> to vector<8x32xf32>
      %225 = arith.mulf %220, %224 : vector<8x32xf32>
      %226 = vector.broadcast %206 : vector<1x32xf32> to vector<8x32xf32>
      %227 = arith.mulf %225, %226 : vector<8x32xf32>
      %228 = vector.broadcast %207 : vector<1x32xf32> to vector<8x32xf32>
      %229 = arith.addf %227, %228 : vector<8x32xf32>
      %230 = arith.truncf %229 : vector<8x32xf32> to vector<8x32xbf16>
      %c0_130 = arith.constant 0 : index
      %c0_131 = arith.constant 0 : index
      %231 = vector.load %arg9[%c0_130, %c0_131] : memref<32x64xbf16, #tpu.memory_space<vmem>>, vector<32x64xbf16>
      %cst_132 = arith.constant dense<0.000000e+00> : vector<8x64xf32>
      %232 = tpu.matmul %230, %231, %cst_132 {dimension_numbers = #tpu.dot_dimension_numbers<[1], [0], [0], [1], [0, 0, 1, 1], [], []>} : vector<8x32xbf16>, vector<32x64xbf16>, vector<8x64xf32> -> vector<8x64xf32>
      %c0_133 = arith.constant 0 : index
      %c0_134 = arith.constant 0 : index
      %233 = vector.load %arg10[%c0_133, %c0_134] : memref<1x64xf32, #tpu.memory_space<vmem>>, vector<1x64xf32>
      %234 = vector.broadcast %233 : vector<1x64xf32> to vector<8x64xf32>
      %235 = arith.addf %232, %234 : vector<8x64xf32>
      %236 = vector.extract_strided_slice %235 {offsets = [0, 0], sizes = [8, 32], strides = [1, 1]} : vector<8x64xf32> to vector<8x32xf32>
      %237 = tpu.transpose %236, [1, 0] : vector<8x32xf32> -> vector<32x8xf32>
      %238 = arith.truncf %237 : vector<32x8xf32> to vector<32x8xbf16>
      %c0_135 = arith.constant 0 : index
      %c0_136 = arith.constant 0 : index
      %239 = vector.load %arg21[%c0_135, %c0_136] : memref<32x8xbf16, #tpu.memory_space<vmem>>, vector<32x8xbf16>
      tpu.vector_store %arg21[%c0_135, %c0_136], %238 {strides = array<i32>} : memref<32x8xbf16, #tpu.memory_space<vmem>>, vector<32x8xbf16>,
      %240 = vector.extract_strided_slice %235 {offsets = [0, 32], sizes = [8, 32], strides = [1, 1]} : vector<8x64xf32> to vector<8x32xf32>
      %241 = arith.truncf %240 : vector<8x32xf32> to vector<8x32xbf16>
      %c0_137 = arith.constant 0 : index
      %c0_138 = arith.constant 0 : index
      %242 = vector.load %arg22[%c0_137, %c0_138] : memref<8x32xbf16, #tpu.memory_space<vmem>>, vector<8x32xbf16>
      tpu.vector_store %arg22[%c0_137, %c0_138], %241 {strides = array<i32>} : memref<8x32xbf16, #tpu.memory_space<vmem>>, vector<8x32xbf16>,
    } else {
    }
    %c0 = arith.constant 0 : index
    %c0_1 = arith.constant 0 : index
    %c0_2 = arith.constant 0 : index
    %3 = vector.load %arg2[%c0, %c0_1, %c0_2] : memref<1x8x32xf32, #tpu.memory_space<vmem>>, vector<1x8x32xf32>
    %4 = vector.shape_cast %3 : vector<1x8x32xf32> to vector<8x32xf32>
    %c0_3 = arith.constant 0 : index
    %c0_4 = arith.constant 0 : index
    %5 = vector.load %arg5[%c0_3, %c0_4] : memref<1x32xf32, #tpu.memory_space<vmem>>, vector<1x32xf32>
    %c0_5 = arith.constant 0 : index
    %c0_6 = arith.constant 0 : index
    %6 = vector.load %arg6[%c0_5, %c0_6] : memref<1x32xf32, #tpu.memory_space<vmem>>, vector<1x32xf32>
    %cst = arith.constant dense<0.000000e+00> : vector<8xf32>
    %7 = vector.multi_reduction <add>, %4, %cst [1] : vector<8x32xf32> to vector<8xf32>
    %8 = vector.shape_cast %7 : vector<8xf32> to vector<8x1xf32>
    %cst_7 = arith.constant 3.200000e+01 : f32
    %9 = vector.broadcast %cst_7 : f32 to vector<8x1xf32>
    %10 = arith.divf %8, %9 : vector<8x1xf32>
    %11 = vector.broadcast %10 : vector<8x1xf32> to vector<8x32xf32>
    %12 = arith.subf %4, %11 : vector<8x32xf32>
    %13 = arith.mulf %12, %12 : vector<8x32xf32>
    %cst_8 = arith.constant dense<0.000000e+00> : vector<8xf32>
    %14 = vector.multi_reduction <add>, %13, %cst_8 [1] : vector<8x32xf32> to vector<8xf32>
    %15 = vector.shape_cast %14 : vector<8xf32> to vector<8x1xf32>
    %cst_9 = arith.constant 3.200000e+01 : f32
    %16 = vector.broadcast %cst_9 : f32 to vector<8x1xf32>
    %17 = arith.divf %15, %16 : vector<8x1xf32>
    %18 = vector.broadcast %10 : vector<8x1xf32> to vector<8x32xf32>
    %19 = arith.subf %4, %18 : vector<8x32xf32>
    %cst_10 = arith.constant 9.99999974E-6 : f32
    %20 = vector.broadcast %cst_10 : f32 to vector<8x1xf32>
    %21 = arith.addf %17, %20 : vector<8x1xf32>
    %22 = math.rsqrt %21 : vector<8x1xf32>
    %23 = vector.broadcast %22 : vector<8x1xf32> to vector<8x32xf32>
    %24 = arith.mulf %19, %23 : vector<8x32xf32>
    %25 = vector.broadcast %5 : vector<1x32xf32> to vector<8x32xf32>
    %26 = arith.mulf %24, %25 : vector<8x32xf32>
    %27 = vector.broadcast %6 : vector<1x32xf32> to vector<8x32xf32>
    %28 = arith.addf %26, %27 : vector<8x32xf32>
    %29 = arith.truncf %28 : vector<8x32xf32> to vector<8x32xbf16>
    %c0_11 = arith.constant 0 : index
    %c0_12 = arith.constant 0 : index
    %30 = vector.load %arg7[%c0_11, %c0_12] : memref<32x32xbf16, #tpu.memory_space<vmem>>, vector<32x32xbf16>
    %cst_13 = arith.constant dense<0.000000e+00> : vector<8x32xf32>
    %31 = tpu.matmul %29, %30, %cst_13 {dimension_numbers = #tpu.dot_dimension_numbers<[1], [0], [0], [1], [0, 0, 1, 1], [], []>} : vector<8x32xbf16>, vector<32x32xbf16>, vector<8x32xf32> -> vector<8x32xf32>
    %c0_14 = arith.constant 0 : index
    %c0_15 = arith.constant 0 : index
    %32 = vector.load %arg8[%c0_14, %c0_15] : memref<1x32xf32, #tpu.memory_space<vmem>>, vector<1x32xf32>
    %33 = vector.broadcast %32 : vector<1x32xf32> to vector<8x32xf32>
    %34 = arith.addf %31, %33 : vector<8x32xf32>
    %35 = arith.truncf %34 : vector<8x32xf32> to vector<8x32xbf16>
    %c0_16 = arith.constant 0 : index
    %c0_17 = arith.constant 0 : index
    %c0_18 = arith.constant 0 : index
    %36 = vector.load %arg4[%c0_16, %c0_17, %c0_18] : memref<1x1x8xf32, #tpu.memory_space<vmem>>, vector<1x1x8xf32>
    %37 = vector.shape_cast %36 : vector<1x1x8xf32> to vector<1x8xf32>
    %cst_19 = arith.constant 0.000000e+00 : f32
    %38 = vector.broadcast %cst_19 : f32 to vector<8x8xf32>
    %c0_20 = arith.constant 0 : index
    %c0_21 = arith.constant 0 : index
    %39 = vector.load %arg24[%c0_20, %c0_21] : memref<8x8xf32, #tpu.memory_space<vmem>>, vector<8x8xf32>
    tpu.vector_store %arg24[%c0_20, %c0_21], %38 {strides = array<i32>} : memref<8x8xf32, #tpu.memory_space<vmem>>, vector<8x8xf32>,
    %40 = vector.extract_strided_slice %35 {offsets = [0, 0], sizes = [8, 8], strides = [1, 1]} : vector<8x32xbf16> to vector<8x8xbf16>
    %c0_22 = arith.constant 0 : index
    %c0_23 = arith.constant 0 : index
    %41 = vector.load %arg21[%c0_22, %c0_23] : memref<32x8xbf16, #tpu.memory_space<vmem>>, vector<8x8xbf16>
    %cst_24 = arith.constant dense<0.000000e+00> : vector<8x8xf32>
    %42 = tpu.matmul %40, %41, %cst_24 {dimension_numbers = #tpu.dot_dimension_numbers<[1], [0], [0], [1], [0, 0, 1, 1], [], []>} : vector<8x8xbf16>, vector<8x8xbf16>, vector<8x8xf32> -> vector<8x8xf32>
    %cst_25 = arith.constant 0.353553385 : f32
    %43 = vector.broadcast %cst_25 : f32 to vector<8x8xf32>
    %44 = arith.mulf %42, %43 : vector<8x8xf32>
    %45 = vector.broadcast %37 : vector<1x8xf32> to vector<8x8xf32>
    %46 = arith.addf %44, %45 : vector<8x8xf32>
    %cst_26 = arith.constant dense<0xFF800000> : vector<8xf32>
    %47 = vector.multi_reduction <maximumf>, %46, %cst_26 [1] : vector<8x8xf32> to vector<8xf32>
    %48 = vector.shape_cast %47 : vector<8xf32> to vector<8x1xf32>
    %49 = vector.broadcast %48 : vector<8x1xf32> to vector<8x8xf32>
    %50 = arith.subf %46, %49 : vector<8x8xf32>
    %51 = math.exp %50 : vector<8x8xf32>
    %cst_27 = arith.constant dense<0.000000e+00> : vector<8xf32>
    %52 = vector.multi_reduction <add>, %51, %cst_27 [1] : vector<8x8xf32> to vector<8xf32>
    %53 = vector.shape_cast %52 : vector<8xf32> to vector<8x1xf32>
    %54 = tpu.reciprocal %53 {approx = true} : vector<8x1xf32> -> vector<8x1xf32>
    %55 = vector.broadcast %54 : vector<8x1xf32> to vector<8x8xf32>
    %56 = arith.mulf %51, %55 : vector<8x8xf32>
    %c0_28 = arith.constant 0 : index
    %c0_29 = arith.constant 0 : index
    %57 = vector.load %arg24[%c0_28, %c0_29] : memref<8x8xf32, #tpu.memory_space<vmem>>, vector<8x8xf32>
    %58 = arith.addf %57, %56 : vector<8x8xf32>
    %c0_30 = arith.constant 0 : index
    %c0_31 = arith.constant 0 : index
    %59 = vector.load %arg24[%c0_30, %c0_31] : memref<8x8xf32, #tpu.memory_space<vmem>>, vector<8x8xf32>
    tpu.vector_store %arg24[%c0_30, %c0_31], %58 {strides = array<i32>} : memref<8x8xf32, #tpu.memory_space<vmem>>, vector<8x8xf32>,
    %c0_32 = arith.constant 0 : index
    %c0_33 = arith.constant 0 : index
    %60 = vector.load %arg22[%c0_32, %c0_33] : memref<8x32xbf16, #tpu.memory_space<vmem>>, vector<8x8xbf16>
    %61 = arith.truncf %56 : vector<8x8xf32> to vector<8x8xbf16>
    %cst_34 = arith.constant dense<0.000000e+00> : vector<8x8xf32>
    %62 = tpu.matmul %61, %60, %cst_34 {dimension_numbers = #tpu.dot_dimension_numbers<[1], [0], [0], [1], [0, 0, 1, 1], [], []>} : vector<8x8xbf16>, vector<8x8xbf16>, vector<8x8xf32> -> vector<8x8xf32>
    %c0_35 = arith.constant 0 : index
    %c0_36 = arith.constant 0 : index
    %63 = vector.load %arg23[%c0_35, %c0_36] : memref<8x32xf32, #tpu.memory_space<vmem>>, vector<8x8xf32>
    tpu.vector_store %arg23[%c0_35, %c0_36], %62 {strides = array<i32>} : memref<8x32xf32, #tpu.memory_space<vmem>>, vector<8x8xf32>,
    %64 = vector.extract_strided_slice %35 {offsets = [0, 8], sizes = [8, 8], strides = [1, 1]} : vector<8x32xbf16> to vector<8x8xbf16>
    %c8 = arith.constant 8 : index
    %c0_37 = arith.constant 0 : index
    %65 = vector.load %arg21[%c8, %c0_37] : memref<32x8xbf16, #tpu.memory_space<vmem>>, vector<8x8xbf16>
    %cst_38 = arith.constant dense<0.000000e+00> : vector<8x8xf32>
    %66 = tpu.matmul %64, %65, %cst_38 {dimension_numbers = #tpu.dot_dimension_numbers<[1], [0], [0], [1], [0, 0, 1, 1], [], []>} : vector<8x8xbf16>, vector<8x8xbf16>, vector<8x8xf32> -> vector<8x8xf32>
    %cst_39 = arith.constant 0.353553385 : f32
    %67 = vector.broadcast %cst_39 : f32 to vector<8x8xf32>
    %68 = arith.mulf %66, %67 : vector<8x8xf32>
    %69 = vector.broadcast %37 : vector<1x8xf32> to vector<8x8xf32>
    %70 = arith.addf %68, %69 : vector<8x8xf32>
    %cst_40 = arith.constant dense<0xFF800000> : vector<8xf32>
    %71 = vector.multi_reduction <maximumf>, %70, %cst_40 [1] : vector<8x8xf32> to vector<8xf32>
    %72 = vector.shape_cast %71 : vector<8xf32> to vector<8x1xf32>
    %73 = vector.broadcast %72 : vector<8x1xf32> to vector<8x8xf32>
    %74 = arith.subf %70, %73 : vector<8x8xf32>
    %75 = math.exp %74 : vector<8x8xf32>
    %cst_41 = arith.constant dense<0.000000e+00> : vector<8xf32>
    %76 = vector.multi_reduction <add>, %75, %cst_41 [1] : vector<8x8xf32> to vector<8xf32>
    %77 = vector.shape_cast %76 : vector<8xf32> to vector<8x1xf32>
    %78 = tpu.reciprocal %77 {approx = true} : vector<8x1xf32> -> vector<8x1xf32>
    %79 = vector.broadcast %78 : vector<8x1xf32> to vector<8x8xf32>
    %80 = arith.mulf %75, %79 : vector<8x8xf32>
    %c0_42 = arith.constant 0 : index
    %c0_43 = arith.constant 0 : index
    %81 = vector.load %arg24[%c0_42, %c0_43] : memref<8x8xf32, #tpu.memory_space<vmem>>, vector<8x8xf32>
    %82 = arith.addf %81, %80 : vector<8x8xf32>
    %c0_44 = arith.constant 0 : index
    %c0_45 = arith.constant 0 : index
    %83 = vector.load %arg24[%c0_44, %c0_45] : memref<8x8xf32, #tpu.memory_space<vmem>>, vector<8x8xf32>
    tpu.vector_store %arg24[%c0_44, %c0_45], %82 {strides = array<i32>} : memref<8x8xf32, #tpu.memory_space<vmem>>, vector<8x8xf32>,
    %c0_46 = arith.constant 0 : index
    %c8_47 = arith.constant 8 : index
    %84 = vector.load %arg22[%c0_46, %c8_47] : memref<8x32xbf16, #tpu.memory_space<vmem>>, vector<8x8xbf16>
    %85 = arith.truncf %80 : vector<8x8xf32> to vector<8x8xbf16>
    %cst_48 = arith.constant dense<0.000000e+00> : vector<8x8xf32>
    %86 = tpu.matmul %85, %84, %cst_48 {dimension_numbers = #tpu.dot_dimension_numbers<[1], [0], [0], [1], [0, 0, 1, 1], [], []>} : vector<8x8xbf16>, vector<8x8xbf16>, vector<8x8xf32> -> vector<8x8xf32>
    %c0_49 = arith.constant 0 : index
    %c8_50 = arith.constant 8 : index
    %87 = vector.load %arg23[%c0_49, %c8_50] : memref<8x32xf32, #tpu.memory_space<vmem>>, vector<8x8xf32>
    tpu.vector_store %arg23[%c0_49, %c8_50], %86 {strides = array<i32>} : memref<8x32xf32, #tpu.memory_space<vmem>>, vector<8x8xf32>,
    %88 = vector.extract_strided_slice %35 {offsets = [0, 16], sizes = [8, 8], strides = [1, 1]} : vector<8x32xbf16> to vector<8x8xbf16>
    %c16 = arith.constant 16 : index
    %c0_51 = arith.constant 0 : index
    %89 = vector.load %arg21[%c16, %c0_51] : memref<32x8xbf16, #tpu.memory_space<vmem>>, vector<8x8xbf16>
    %cst_52 = arith.constant dense<0.000000e+00> : vector<8x8xf32>
    %90 = tpu.matmul %88, %89, %cst_52 {dimension_numbers = #tpu.dot_dimension_numbers<[1], [0], [0], [1], [0, 0, 1, 1], [], []>} : vector<8x8xbf16>, vector<8x8xbf16>, vector<8x8xf32> -> vector<8x8xf32>
    %cst_53 = arith.constant 0.353553385 : f32
    %91 = vector.broadcast %cst_53 : f32 to vector<8x8xf32>
    %92 = arith.mulf %90, %91 : vector<8x8xf32>
    %93 = vector.broadcast %37 : vector<1x8xf32> to vector<8x8xf32>
    %94 = arith.addf %92, %93 : vector<8x8xf32>
    %cst_54 = arith.constant dense<0xFF800000> : vector<8xf32>
    %95 = vector.multi_reduction <maximumf>, %94, %cst_54 [1] : vector<8x8xf32> to vector<8xf32>
    %96 = vector.shape_cast %95 : vector<8xf32> to vector<8x1xf32>
    %97 = vector.broadcast %96 : vector<8x1xf32> to vector<8x8xf32>
    %98 = arith.subf %94, %97 : vector<8x8xf32>
    %99 = math.exp %98 : vector<8x8xf32>
    %cst_55 = arith.constant dense<0.000000e+00> : vector<8xf32>
    %100 = vector.multi_reduction <add>, %99, %cst_55 [1] : vector<8x8xf32> to vector<8xf32>
    %101 = vector.shape_cast %100 : vector<8xf32> to vector<8x1xf32>
    %102 = tpu.reciprocal %101 {approx = true} : vector<8x1xf32> -> vector<8x1xf32>
    %103 = vector.broadcast %102 : vector<8x1xf32> to vector<8x8xf32>
    %104 = arith.mulf %99, %103 : vector<8x8xf32>
    %c0_56 = arith.constant 0 : index
    %c0_57 = arith.constant 0 : index
    %105 = vector.load %arg24[%c0_56, %c0_57] : memref<8x8xf32, #tpu.memory_space<vmem>>, vector<8x8xf32>
    %106 = arith.addf %105, %104 : vector<8x8xf32>
    %c0_58 = arith.constant 0 : index
    %c0_59 = arith.constant 0 : index
    %107 = vector.load %arg24[%c0_58, %c0_59] : memref<8x8xf32, #tpu.memory_space<vmem>>, vector<8x8xf32>
    tpu.vector_store %arg24[%c0_58, %c0_59], %106 {strides = array<i32>} : memref<8x8xf32, #tpu.memory_space<vmem>>, vector<8x8xf32>,
    %c0_60 = arith.constant 0 : index
    %c16_61 = arith.constant 16 : index
    %108 = vector.load %arg22[%c0_60, %c16_61] : memref<8x32xbf16, #tpu.memory_space<vmem>>, vector<8x8xbf16>
    %109 = arith.truncf %104 : vector<8x8xf32> to vector<8x8xbf16>
    %cst_62 = arith.constant dense<0.000000e+00> : vector<8x8xf32>
    %110 = tpu.matmul %109, %108, %cst_62 {dimension_numbers = #tpu.dot_dimension_numbers<[1], [0], [0], [1], [0, 0, 1, 1], [], []>} : vector<8x8xbf16>, vector<8x8xbf16>, vector<8x8xf32> -> vector<8x8xf32>
    %c0_63 = arith.constant 0 : index
    %c16_64 = arith.constant 16 : index
    %111 = vector.load %arg23[%c0_63, %c16_64] : memref<8x32xf32, #tpu.memory_space<vmem>>, vector<8x8xf32>
    tpu.vector_store %arg23[%c0_63, %c16_64], %110 {strides = array<i32>} : memref<8x32xf32, #tpu.memory_space<vmem>>, vector<8x8xf32>,
    %112 = vector.extract_strided_slice %35 {offsets = [0, 24], sizes = [8, 8], strides = [1, 1]} : vector<8x32xbf16> to vector<8x8xbf16>
    %c24 = arith.constant 24 : index
    %c0_65 = arith.constant 0 : index
    %113 = vector.load %arg21[%c24, %c0_65] : memref<32x8xbf16, #tpu.memory_space<vmem>>, vector<8x8xbf16>
    %cst_66 = arith.constant dense<0.000000e+00> : vector<8x8xf32>
    %114 = tpu.matmul %112, %113, %cst_66 {dimension_numbers = #tpu.dot_dimension_numbers<[1], [0], [0], [1], [0, 0, 1, 1], [], []>} : vector<8x8xbf16>, vector<8x8xbf16>, vector<8x8xf32> -> vector<8x8xf32>
    %cst_67 = arith.constant 0.353553385 : f32
    %115 = vector.broadcast %cst_67 : f32 to vector<8x8xf32>
    %116 = arith.mulf %114, %115 : vector<8x8xf32>
    %117 = vector.broadcast %37 : vector<1x8xf32> to vector<8x8xf32>
    %118 = arith.addf %116, %117 : vector<8x8xf32>
    %cst_68 = arith.constant dense<0xFF800000> : vector<8xf32>
    %119 = vector.multi_reduction <maximumf>, %118, %cst_68 [1] : vector<8x8xf32> to vector<8xf32>
    %120 = vector.shape_cast %119 : vector<8xf32> to vector<8x1xf32>
    %121 = vector.broadcast %120 : vector<8x1xf32> to vector<8x8xf32>
    %122 = arith.subf %118, %121 : vector<8x8xf32>
    %123 = math.exp %122 : vector<8x8xf32>
    %cst_69 = arith.constant dense<0.000000e+00> : vector<8xf32>
    %124 = vector.multi_reduction <add>, %123, %cst_69 [1] : vector<8x8xf32> to vector<8xf32>
    %125 = vector.shape_cast %124 : vector<8xf32> to vector<8x1xf32>
    %126 = tpu.reciprocal %125 {approx = true} : vector<8x1xf32> -> vector<8x1xf32>
    %127 = vector.broadcast %126 : vector<8x1xf32> to vector<8x8xf32>
    %128 = arith.mulf %123, %127 : vector<8x8xf32>
    %c0_70 = arith.constant 0 : index
    %c0_71 = arith.constant 0 : index
    %129 = vector.load %arg24[%c0_70, %c0_71] : memref<8x8xf32, #tpu.memory_space<vmem>>, vector<8x8xf32>
    %130 = arith.addf %129, %128 : vector<8x8xf32>
    %c0_72 = arith.constant 0 : index
    %c0_73 = arith.constant 0 : index
    %131 = vector.load %arg24[%c0_72, %c0_73] : memref<8x8xf32, #tpu.memory_space<vmem>>, vector<8x8xf32>
    tpu.vector_store %arg24[%c0_72, %c0_73], %130 {strides = array<i32>} : memref<8x8xf32, #tpu.memory_space<vmem>>, vector<8x8xf32>,
    %c0_74 = arith.constant 0 : index
    %c24_75 = arith.constant 24 : index
    %132 = vector.load %arg22[%c0_74, %c24_75] : memref<8x32xbf16, #tpu.memory_space<vmem>>, vector<8x8xbf16>
    %133 = arith.truncf %128 : vector<8x8xf32> to vector<8x8xbf16>
    %cst_76 = arith.constant dense<0.000000e+00> : vector<8x8xf32>
    %134 = tpu.matmul %133, %132, %cst_76 {dimension_numbers = #tpu.dot_dimension_numbers<[1], [0], [0], [1], [0, 0, 1, 1], [], []>} : vector<8x8xbf16>, vector<8x8xbf16>, vector<8x8xf32> -> vector<8x8xf32>
    %c0_77 = arith.constant 0 : index
    %c24_78 = arith.constant 24 : index
    %135 = vector.load %arg23[%c0_77, %c24_78] : memref<8x32xf32, #tpu.memory_space<vmem>>, vector<8x8xf32>
    tpu.vector_store %arg23[%c0_77, %c24_78], %134 {strides = array<i32>} : memref<8x32xf32, #tpu.memory_space<vmem>>, vector<8x8xf32>,
    %c0_79 = arith.constant 0 : index
    %c0_80 = arith.constant 0 : index
    %136 = vector.load %arg24[%c0_79, %c0_80] : memref<8x8xf32, #tpu.memory_space<vmem>>, vector<8x8xf32>
    %cst_81 = arith.constant 2.500000e-01 : f32
    %137 = vector.broadcast %cst_81 : f32 to vector<8x8xf32>
    %138 = arith.mulf %136, %137 : vector<8x8xf32>
    %139 = arith.truncf %138 : vector<8x8xf32> to vector<8x8xbf16>
    %c0_82 = arith.constant 0 : index
    %c0_83 = arith.constant 0 : index
    %c0_84 = arith.constant 0 : index
    %140 = vector.load %arg20[%c0_82, %c0_83, %c0_84] : memref<1x8x8xbf16, #tpu.memory_space<vmem>>, vector<1x8x8xbf16>
    %141 = vector.shape_cast %140 : vector<1x8x8xbf16> to vector<8x8xbf16>
    %142 = vector.shape_cast %139 : vector<8x8xbf16> to vector<1x8x8xbf16>
    tpu.vector_store %arg20[%c0_82, %c0_83, %c0_84], %142 {strides = array<i32>} : memref<1x8x8xbf16, #tpu.memory_space<vmem>>, vector<1x8x8xbf16>,
    %c0_85 = arith.constant 0 : index
    %c0_86 = arith.constant 0 : index
    %143 = vector.load %arg23[%c0_85, %c0_86] : memref<8x32xf32, #tpu.memory_space<vmem>>, vector<8x32xf32>
    %144 = arith.truncf %143 : vector<8x32xf32> to vector<8x32xbf16>
    %c0_87 = arith.constant 0 : index
    %c0_88 = arith.constant 0 : index
    %145 = vector.load %arg11[%c0_87, %c0_88] : memref<32x32xbf16, #tpu.memory_space<vmem>>, vector<32x32xbf16>
    %cst_89 = arith.constant dense<0.000000e+00> : vector<8x32xf32>
    %146 = tpu.matmul %144, %145, %cst_89 {dimension_numbers = #tpu.dot_dimension_numbers<[1], [0], [0], [1], [0, 0, 1, 1], [], []>} : vector<8x32xbf16>, vector<32x32xbf16>, vector<8x32xf32> -> vector<8x32xf32>
    %c0_90 = arith.constant 0 : index
    %c0_91 = arith.constant 0 : index
    %147 = vector.load %arg12[%c0_90, %c0_91] : memref<1x32xf32, #tpu.memory_space<vmem>>, vector<1x32xf32>
    %148 = vector.broadcast %147 : vector<1x32xf32> to vector<8x32xf32>
    %149 = arith.addf %146, %148 : vector<8x32xf32>
    %150 = arith.addf %4, %149 : vector<8x32xf32>
    %c0_92 = arith.constant 0 : index
    %c0_93 = arith.constant 0 : index
    %151 = vector.load %arg13[%c0_92, %c0_93] : memref<1x32xf32, #tpu.memory_space<vmem>>, vector<1x32xf32>
    %c0_94 = arith.constant 0 : index
    %c0_95 = arith.constant 0 : index
    %152 = vector.load %arg14[%c0_94, %c0_95] : memref<1x32xf32, #tpu.memory_space<vmem>>, vector<1x32xf32>
    %cst_96 = arith.constant dense<0.000000e+00> : vector<8xf32>
    %153 = vector.multi_reduction <add>, %150, %cst_96 [1] : vector<8x32xf32> to vector<8xf32>
    %154 = vector.shape_cast %153 : vector<8xf32> to vector<8x1xf32>
    %cst_97 = arith.constant 3.200000e+01 : f32
    %155 = vector.broadcast %cst_97 : f32 to vector<8x1xf32>
    %156 = arith.divf %154, %155 : vector<8x1xf32>
    %157 = vector.broadcast %156 : vector<8x1xf32> to vector<8x32xf32>
    %158 = arith.subf %150, %157 : vector<8x32xf32>
    %159 = arith.mulf %158, %158 : vector<8x32xf32>
    %cst_98 = arith.constant dense<0.000000e+00> : vector<8xf32>
    %160 = vector.multi_reduction <add>, %159, %cst_98 [1] : vector<8x32xf32> to vector<8xf32>
    %161 = vector.shape_cast %160 : vector<8xf32> to vector<8x1xf32>
    %cst_99 = arith.constant 3.200000e+01 : f32
    %162 = vector.broadcast %cst_99 : f32 to vector<8x1xf32>
    %163 = arith.divf %161, %162 : vector<8x1xf32>
    %164 = vector.broadcast %156 : vector<8x1xf32> to vector<8x32xf32>
    %165 = arith.subf %150, %164 : vector<8x32xf32>
    %cst_100 = arith.constant 9.99999974E-6 : f32
    %166 = vector.broadcast %cst_100 : f32 to vector<8x1xf32>
    %167 = arith.addf %163, %166 : vector<8x1xf32>
    %168 = math.rsqrt %167 : vector<8x1xf32>
    %169 = vector.broadcast %168 : vector<8x1xf32> to vector<8x32xf32>
    %170 = arith.mulf %165, %169 : vector<8x32xf32>
    %171 = vector.broadcast %151 : vector<1x32xf32> to vector<8x32xf32>
    %172 = arith.mulf %170, %171 : vector<8x32xf32>
    %173 = vector.broadcast %152 : vector<1x32xf32> to vector<8x32xf32>
    %174 = arith.addf %172, %173 : vector<8x32xf32>
    %175 = arith.truncf %174 : vector<8x32xf32> to vector<8x32xbf16>
    %c0_101 = arith.constant 0 : index
    %c0_102 = arith.constant 0 : index
    %176 = vector.load %arg15[%c0_101, %c0_102] : memref<32x64xbf16, #tpu.memory_space<vmem>>, vector<32x64xbf16>
    %cst_103 = arith.constant dense<0.000000e+00> : vector<8x64xf32>
    %177 = tpu.matmul %175, %176, %cst_103 {dimension_numbers = #tpu.dot_dimension_numbers<[1], [0], [0], [1], [0, 0, 1, 1], [], []>} : vector<8x32xbf16>, vector<32x64xbf16>, vector<8x64xf32> -> vector<8x64xf32>
    %c0_104 = arith.constant 0 : index
    %c0_105 = arith.constant 0 : index
    %178 = vector.load %arg16[%c0_104, %c0_105] : memref<1x64xf32, #tpu.memory_space<vmem>>, vector<1x64xf32>
    %179 = vector.broadcast %178 : vector<1x64xf32> to vector<8x64xf32>
    %180 = arith.addf %177, %179 : vector<8x64xf32>
    %cst_106 = arith.constant 5.000000e-01 : f32
    %181 = vector.broadcast %cst_106 : f32 to vector<8x64xf32>
    %182 = arith.mulf %181, %180 : vector<8x64xf32>
    %cst_107 = arith.constant 4.471500e-02 : f32
    %183 = vector.broadcast %cst_107 : f32 to vector<8x64xf32>
    %184 = arith.mulf %183, %180 : vector<8x64xf32>
    %185 = arith.mulf %184, %180 : vector<8x64xf32>
    %186 = arith.mulf %185, %180 : vector<8x64xf32>
    %187 = arith.addf %180, %186 : vector<8x64xf32>
    %cst_108 = arith.constant 0.797884583 : f32
    %188 = vector.broadcast %cst_108 : f32 to vector<8x64xf32>
    %189 = arith.mulf %188, %187 : vector<8x64xf32>
    %190 = math.tanh %189 : vector<8x64xf32>
    %cst_109 = arith.constant 1.000000e+00 : f32
    %191 = vector.broadcast %cst_109 : f32 to vector<8x64xf32>
    %192 = arith.addf %191, %190 : vector<8x64xf32>
    %193 = arith.mulf %182, %192 : vector<8x64xf32>
    %194 = arith.truncf %193 : vector<8x64xf32> to vector<8x64xbf16>
    %c0_110 = arith.constant 0 : index
    %c0_111 = arith.constant 0 : index
    %195 = vector.load %arg17[%c0_110, %c0_111] : memref<64x32xbf16, #tpu.memory_space<vmem>>, vector<64x32xbf16>
    %cst_112 = arith.constant dense<0.000000e+00> : vector<8x32xf32>
    %196 = tpu.matmul %194, %195, %cst_112 {dimension_numbers = #tpu.dot_dimension_numbers<[1], [0], [0], [1], [0, 0, 1, 1], [], []>} : vector<8x64xbf16>, vector<64x32xbf16>, vector<8x32xf32> -> vector<8x32xf32>
    %c0_113 = arith.constant 0 : index
    %c0_114 = arith.constant 0 : index
    %197 = vector.load %arg18[%c0_113, %c0_114] : memref<1x32xf32, #tpu.memory_space<vmem>>, vector<1x32xf32>
    %198 = vector.broadcast %197 : vector<1x32xf32> to vector<8x32xf32>
    %199 = arith.addf %196, %198 : vector<8x32xf32>
    %c0_115 = arith.constant 0 : index
    %c0_116 = arith.constant 0 : index
    %c0_117 = arith.constant 0 : index
    %200 = vector.load %arg19[%c0_115, %c0_116, %c0_117] : memref<1x8x32xf32, #tpu.memory_space<vmem>>, vector<1x8x32xf32>
    %201 = vector.shape_cast %200 : vector<1x8x32xf32> to vector<8x32xf32>
    %202 = vector.shape_cast %199 : vector<8x32xf32> to vector<1x8x32xf32>
    tpu.vector_store %arg19[%c0_115, %c0_116, %c0_117], %202 {strides = array<i32>} : memref<1x8x32xf32, #tpu.memory_space<vmem>>, vector<1x8x32xf32>,
    return
  }
  func.func @transform_0(%arg0: i32, %arg1: i32) -> (i32, i32, i32) {
    %c0_i32 = arith.constant 0 : i32
    %c0_i32_0 = arith.constant 0 : i32
    return %arg0, %arg1, %c0_i32 : i32, i32, i32
  }
  func.func @transform_1(%arg0: i32, %arg1: i32) -> (i32, i32, i32) {
    %c0_i32 = arith.constant 0 : i32
    %c0_i32_0 = arith.constant 0 : i32
    %c0_i32_1 = arith.constant 0 : i32
    return %arg0, %c0_i32, %c0_i32_0 : i32, i32, i32
  }
  func.func @transform_2(%arg0: i32, %arg1: i32) -> (i32, i32, i32) {
    %c0_i32 = arith.constant 0 : i32
    %c0_i32_0 = arith.constant 0 : i32
    %c0_i32_1 = arith.constant 0 : i32
    return %arg0, %c0_i32, %c0_i32_0 : i32, i32, i32
  }
  func.func @transform_3(%arg0: i32, %arg1: i32) -> (i32, i32) {
    %c0_i32 = arith.constant 0 : i32
    %c0_i32_0 = arith.constant 0 : i32
    %c0_i32_1 = arith.constant 0 : i32
    return %c0_i32, %c0_i32_0 : i32, i32
  }
  func.func @transform_4(%arg0: i32, %arg1: i32) -> (i32, i32) {
    %c0_i32 = arith.constant 0 : i32
    %c0_i32_0 = arith.constant 0 : i32
    %c0_i32_1 = arith.constant 0 : i32
    return %c0_i32, %c0_i32_0 : i32, i32
  }
  func.func @transform_5(%arg0: i32, %arg1: i32) -> (i32, i32) {
    %c0_i32 = arith.constant 0 : i32
    %c0_i32_0 = arith.constant 0 : i32
    %c0_i32_1 = arith.constant 0 : i32
    return %c0_i32, %c0_i32_0 : i32, i32
  }
  func.func @transform_6(%arg0: i32, %arg1: i32) -> (i32, i32) {
    %c0_i32 = arith.constant 0 : i32
    %c0_i32_0 = arith.constant 0 : i32
    %c0_i32_1 = arith.constant 0 : i32
    return %c0_i32, %c0_i32_0 : i32, i32
  }
  func.func @transform_7(%arg0: i32, %arg1: i32) -> (i32, i32) {
    %c0_i32 = arith.constant 0 : i32
    %c0_i32_0 = arith.constant 0 : i32
    %c0_i32_1 = arith.constant 0 : i32
    return %c0_i32, %c0_i32_0 : i32, i32
  }
  func.func @transform_8(%arg0: i32, %arg1: i32) -> (i32, i32) {
    %c0_i32 = arith.constant 0 : i32
    %c0_i32_0 = arith.constant 0 : i32
    %c0_i32_1 = arith.constant 0 : i32
    return %c0_i32, %c0_i32_0 : i32, i32
  }
  func.func @transform_9(%arg0: i32, %arg1: i32) -> (i32, i32) {
    %c0_i32 = arith.constant 0 : i32
    %c0_i32_0 = arith.constant 0 : i32
    %c0_i32_1 = arith.constant 0 : i32
    return %c0_i32, %c0_i32_0 : i32, i32
  }
  func.func @transform_10(%arg0: i32, %arg1: i32) -> (i32, i32) {
    %c0_i32 = arith.constant 0 : i32
    %c0_i32_0 = arith.constant 0 : i32
    %c0_i32_1 = arith.constant 0 : i32
    return %c0_i32, %c0_i32_0 : i32, i32
  }
  func.func @transform_11(%arg0: i32, %arg1: i32) -> (i32, i32) {
    %c0_i32 = arith.constant 0 : i32
    %c0_i32_0 = arith.constant 0 : i32
    %c0_i32_1 = arith.constant 0 : i32
    return %c0_i32, %c0_i32_0 : i32, i32
  }
  func.func @transform_12(%arg0: i32, %arg1: i32) -> (i32, i32) {
    %c0_i32 = arith.constant 0 : i32
    %c0_i32_0 = arith.constant 0 : i32
    %c0_i32_1 = arith.constant 0 : i32
    return %c0_i32, %c0_i32_0 : i32, i32
  }
  func.func @transform_13(%arg0: i32, %arg1: i32) -> (i32, i32) {
    %c0_i32 = arith.constant 0 : i32
    %c0_i32_0 = arith.constant 0 : i32
    %c0_i32_1 = arith.constant 0 : i32
    return %c0_i32, %c0_i32_0 : i32, i32
  }
  func.func @transform_14(%arg0: i32, %arg1: i32) -> (i32, i32) {
    %c0_i32 = arith.constant 0 : i32
    %c0_i32_0 = arith.constant 0 : i32
    %c0_i32_1 = arith.constant 0 : i32
    return %c0_i32, %c0_i32_0 : i32, i32
  }
  func.func @transform_15(%arg0: i32, %arg1: i32) -> (i32, i32) {
    %c0_i32 = arith.constant 0 : i32
    %c0_i32_0 = arith.constant 0 : i32
    %c0_i32_1 = arith.constant 0 : i32
    return %c0_i32, %c0_i32_0 : i32, i32
  }
  func.func @transform_16(%arg0: i32, %arg1: i32) -> (i32, i32) {
    %c0_i32 = arith.constant 0 : i32
    %c0_i32_0 = arith.constant 0 : i32
    %c0_i32_1 = arith.constant 0 : i32
    return %c0_i32, %c0_i32_0 : i32, i32
  }
  func.func @transform_17(%arg0: i32, %arg1: i32) -> (i32, i32, i32) {
    %c0_i32 = arith.constant 0 : i32
    %c0_i32_0 = arith.constant 0 : i32
    return %arg0, %arg1, %c0_i32 : i32, i32, i32
  }
  func.func @transform_18(%arg0: i32, %arg1: i32) -> (i32, i32, i32) {
    %c0_i32 = arith.constant 0 : i32
    %c0_i32_0 = arith.constant 0 : i32
    return %arg0, %arg1, %c0_i32 : i32, i32, i32
  }
}

</mosaic_0001>

<bundles_post_ra>
// kernel: tpu_custom_call.1
= control target key start
LH: loop header
LB: loop body
LE: loop exit
PB: predicated region body
PF: predicated region fallthrough
CT: control target
= control target key end

     0   :  { %s4173_s0 = inlined_call_operand.hbm [shape: f32[2,8,32], index: 0, kind: input, shape index: {}]   ;;  %s4174_s1 = inlined_call_operand.hbm [shape: bf16[2,8,32], index: 1, kind: input, shape index: {}]   ;;  %s4175_s2 = inlined_call_operand.hbm [shape: f32[2,1,8], index: 2, kind: input, shape index: {}]   ;;  %s4176_s3 = inlined_call_operand.hbm [shape: f32[1,32], index: 3, kind: input, shape index: {}]   ;;  %s4177_s4 = inlined_call_operand.hbm [shape: f32[1,32], index: 4, kind: input, shape index: {}]   ;;  %s4178_s5 = inlined_call_operand.hbm [shape: bf16[32,32], index: 5, kind: input, shape index: {}]   ;;  %s4179_s6 = inlined_call_operand.hbm [shape: f32[1,32], index: 6, kind: input, shape index: {}]   ;;  %s4180_s7 = inlined_call_operand.hbm [shape: bf16[32,64], index: 7, kind: input, shape index: {}]   ;;  %s4181_s8 = inlined_call_operand.hbm [shape: f32[1,64], index: 8, kind: input, shape index: {}]   ;;  %s4182_s9 = inlined_call_operand.hbm [shape: bf16[32,32], index: 9, kind: input, shape index: {}]   ;;  %s4183_s10 = inlined_call_operand.hbm [shape: f32[1,32], index: 10, kind: input, shape index: {}]   ;;  %s4184_s11 = inlined_call_operand.hbm [shape: f32[1,32], index: 11, kind: input, shape index: {}]   ;;  %s4185_s12 = inlined_call_operand.hbm [shape: f32[1,32], index: 12, kind: input, shape index: {}]   ;;  %s4186_s13 = inlined_call_operand.hbm [shape: bf16[32,64], index: 13, kind: input, shape index: {}]   ;;  %s4187_s14 = inlined_call_operand.hbm [shape: f32[1,64], index: 14, kind: input, shape index: {}]   ;;  %s4188_s15 = inlined_call_operand.hbm [shape: bf16[64,32], index: 15, kind: input, shape index: {}]   ;;  %s4189_s16 = inlined_call_operand.hbm [shape: f32[1,32], index: 16, kind: input, shape index: {}]   ;;  %s4190_s17 = inlined_call_operand.hbm [shape: f32[2,8,32], index: 17, kind: output, shape index: {0}]   ;;  %s4191_s18 = inlined_call_operand.hbm [shape: bf16[2,8,8], index: 18, kind: output, shape index: {1}]  }
   0x1   :  { %4218 = sst [smem:[#allocation50_spill]] %s4173_s0 }
   0x2   :  { %4219 = sst [smem:[#allocation51_spill]] %s4174_s1 }
   0x3   :  { %4220 = sst [smem:[#allocation52_spill]] %s4175_s2 }
   0x4   :  { %4221 = sst [smem:[#allocation53_spill]] %s4176_s3 }
   0x5   :  { %4222 = sst [smem:[#allocation54_spill]] %s4177_s4 }
   0x6   :  { %4223 = sst [smem:[#allocation55_spill]] %s4178_s5 }
   0x7   :  { %4224 = sst [smem:[#allocation56_spill]] %s4179_s6 }
   0x8   :  { %4225 = sst [smem:[#allocation57_spill]] %s4180_s7 }
   0x9   :  { %4226 = sst [smem:[#allocation58_spill]] %s4181_s8 }
   0xa   :  { %4227 = sst [smem:[#allocation59_spill]] %s4182_s9 }
   0xb   :  { %4228 = sst [smem:[#allocation60_spill]] %s4183_s10 }
   0xc   :  { %4229 = sst [smem:[#allocation61_spill]] %s4184_s11 }
   0xd   :  { %4230 = sst [smem:[#allocation62_spill]] %s4185_s12 }
   0xe   :  { %4231 = sst [smem:[#allocation63_spill]] %s4186_s13 }
   0xf   :  { %4232 = sst [smem:[#allocation64_spill]] %s4187_s14 }
  0x10   :  { %4233 = sst [smem:[#allocation65_spill]] %s4188_s15 }
  0x11   :  { %4234 = sst [smem:[#allocation66_spill]] %s4189_s16 }
  0x12   :  { %4235 = sst [smem:[#allocation67_spill]] %s4190_s17 }
  0x13   :  { %4236 = sst [smem:[#allocation68_spill]] %s4191_s18 }
  0x14   :  { %24 = vsyncpa [#allocation7], 0 }
  0x15   :  { %26 = vsyncpa [#allocation7 + $0x1], 0 }
  0x16   :  { %27 = vsyncpa [#allocation10], 0 }
  0x17   :  { %29 = vsyncpa [#allocation10 + $0x1], 0 }
  0x18   :  { %30 = vsyncpa [#allocation13], 0 }
  0x19   :  { %31 = vsyncpa [#allocation16], 0 }
  0x1a   :  { %32 = vsyncpa [#allocation19], 0 }
  0x1b   :  { %33 = vsyncpa [#allocation22], 0 }
  0x1c   :  { %34 = vsyncpa [#allocation25], 0 }
  0x1d   :  { %35 = vsyncpa [#allocation28], 0 }
  0x1e   :  { %36 = vsyncpa [#allocation31], 0 }
  0x1f   :  { %37 = vsyncpa [#allocation8], 0 }
  0x20   :  { %39 = vsyncpa [#allocation8 + $0x1], 0 }
  0x21   :  { %40 = vsyncpa [#allocation35], 0 }
  0x22   :  { %42 = vsyncpa [#allocation35 + $0x1], 0  ;;  %s3446_s27 = smov 0   ;;  %s3448_s28 = smov 0  }
  0x23   :  { %s3450_s29 = smov 0   ;;  %s3452_s30 = smov 0  }
  0x24   :  { %s3454_s0 = smov 0   ;;  %s3456_s19 = smov 0  }
  0x25 LB: > { %4237 = sst [smem:[#allocation47_spill]] %s3311_s30  ;;  %s3477_s1 = sadd.s32 4294967295, %s3319_s19   ;;  %s3319_s19 = sphi %s3456_s19, %s48_s19   ;;  %s3315_s0 = sphi %s3454_s0, %s4300_s0   ;;  %s3311_s30 = sphi %s3452_s30, %s4299_s30   ;;  %s3307_s29 = sphi %s3450_s29, %s4298_s29   ;;  %s3303_s28 = sphi %s3448_s28, %s4297_s28   ;;  %s3299_s27 = sphi %s3446_s27, %s4296_s27  }
  0x26   : > { %p2210_p0 = scmp.ge.s32.totalorder %s3319_s19, 1  ;;  %p4200_p1 = scmp.eq.s32.totalorder %s3477_s1, 0 }
  0x27   : > { %p495_p2 = scmp.lt.s32.totalorder %s3319_s19, 3  ;;  %s3321_s21 = smov [#allocation12]  }
  0x28   : > { %s508_s22 = sshll.u32 %s3321_s21, 4  ;;  %s3322_s2 = smov [#allocation15]   ;;  %s509_s22 = int_to_ptr.vmem [resolvable:$true] %s508_s22 }
  0x29   : > { %p3482_p3 = pnand %p2210_p0, %p495_p2  ;;  %s529_s23 = sshll.u32 %s3322_s2, 4  ;;  %s3495_s23 = int_to_ptr.vmem [resolvable:$true] %s529_s23 }
  0x2a   : > { %s3323_s25 = smov [#allocation18]   ;;  %s4241_s3 = sld [smem:[#allocation53_spill]] }
  0x2b   : > { %s4238_s20 = scalar_select %p3482_p3, 1, 0 }
  0x2c   : > { %p2489_p5 = pneg %p3482_p3  ;;  %s3497_s26 = sshll.u32 %s3323_s25, 4  ;;  %s554_s26 = int_to_ptr.vmem [resolvable:$true] %s3497_s26 }
  0x2d   : > { %4239 = sst [smem:[#allocation48_spill]] %s4238_s20 }
  0x2e   : > { %p3491_p6 = pnand %p2489_p5, %p4200_p1 }
  0x30   : > { %s4240_s24 = scalar_select %p3491_p6, 1, 0 }
  0x31   : > { %s2691_s21 = scalar_lea.hbm %s4241_s3, 16  ;;  %p3507_p8 = pneg %p3491_p6 }
  0x32   : > { %p2692_p7 = scmp.ne.s32.totalorder %s4241_s3, %s2691_s21  ;;  %p2698_p11 = scmp.lt.u32.totalorder %s2691_s21, %s4241_s3 }
  0x33   : > { %s4242_s2 = scalar_select %p3507_p8, 1, 0 }
  0x34   : > { %p2694_p9 = pnand %p3507_p8, %p2692_p7 }
  0x36   : > { %p2695_p10 = pneg %p2694_p9 }
  0x38   : > { %p2700_p12 = pnand %p2698_p11, %p2695_p10 }
  0x3a   : > { %2703 = shalt.err (!%p2700_p12)
}
  0x3b   : > { %s2704_s17 = scalar_lea.vmem %s509_s22, 16  ;;  %s2711_s18 = scalar_lea.vmem %s509_s22, 32 }
  0x3c   : > { %p2705_p13 = scmp.ne.s32.totalorder %s509_s22, %s2704_s17  ;;  %p2712_p5 = scmp.lt.s32.totalorder %s509_s22, %s509_s22 }
  0x3d   : > { %p2713_p4 = scmp.lt.s32.totalorder %s2711_s18, %s2704_s17 }
  0x3e   : > { %p2707_p0 = pnand %p2705_p13, %p3507_p8 }
  0x3f   : > { %p2714_p1 = por %p2713_p4, %p2712_p5 }
  0x40   : > { %p2708_p2 = pneg %p2707_p0 }
  0x42   : > { %p2715_p3 = pnand %p2714_p1, %p2708_p2 }
  0x44   : > { %2718 = shalt.err (!%p2715_p3)
}
  0x45   : > { %2492 = dma.hbm_to_vmem [thread:$0]  (!%p3491_p6), %s4241_s3, 16, %s509_s22, [#allocation13]  }
  0x46   : > { %s4243_s5 = sld [smem:[#allocation55_spill]] }
  0x4c   : > { %s2719_s25 = scalar_lea.hbm %s4243_s5, 256 }
  0x4d   : > { %p2720_p7 = scmp.ne.s32.totalorder %s4243_s5, %s2719_s25  ;;  %p2726_p1 = scmp.lt.u32.totalorder %s2719_s25, %s4243_s5 }
  0x4f   : > { %p2722_p9 = pnand %p2720_p7, %p3507_p8 }
  0x51   : > { %p2723_p4 = pneg %p2722_p9 }
  0x53   : > { %p2728_p3 = pnand %p2726_p1, %p2723_p4 }
  0x55   : > { %2731 = shalt.err (!%p2728_p3)
}
  0x56   : > { %s2732_s22 = scalar_lea.vmem %s3495_s23, 256  ;;  %p2740_p13 = scmp.lt.s32.totalorder %s3495_s23, %s3495_s23 }
  0x57   : > { %p2733_p10 = scmp.ne.s32.totalorder %s3495_s23, %s2732_s22  ;;  %p2741_p0 = scmp.lt.s32.totalorder %s2732_s22, %s2732_s22 }
  0x59   : > { %p2735_p11 = pnand %p2733_p10, %p3507_p8  ;;  %p2742_p2 = por %p2741_p0, %p2740_p13 }
  0x5b   : > { %p2736_p12 = pneg %p2735_p11 }
  0x5d   : > { %p2743_p5 = pnand %p2742_p2, %p2736_p12 }
  0x5f   : > { %2746 = shalt.err (!%p2743_p5)
}
  0x60   : > { %s3324_s12 = smov 64   ;;  %s3325_s14 = smov 4  }
  0x61   : > { %2498 = dma.hbm_to_vmem [thread:$0]  (!%p3491_p6), %s4243_s5, 256, %s3495_s23, [#allocation16], %s3324_s12, %s3324_s12, %s3325_s14  }
  0x62   : > { %s4244_s7 = sld [smem:[#allocation57_spill]] }
  0x68   : > { %s2747_s25 = scalar_lea.hbm %s4244_s7, 256 }
  0x69   : > { %p2748_p7 = scmp.ne.s32.totalorder %s4244_s7, %s2747_s25  ;;  %p2754_p1 = scmp.lt.u32.totalorder %s2747_s25, %s4244_s7 }
  0x6b   : > { %p2750_p9 = pnand %p2748_p7, %p3507_p8 }
  0x6d   : > { %p2751_p4 = pneg %p2750_p9 }
  0x6f   : > { %p2756_p3 = pnand %p2754_p1, %p2751_p4 }
  0x71   : > { %2759 = shalt.err (!%p2756_p3)
}
  0x72   : > { %s2760_s30 = scalar_lea.vmem %s554_s26, 256  ;;  %p2768_p13 = scmp.lt.s32.totalorder %s554_s26, %s554_s26 }
  0x73   : > { %p2761_p10 = scmp.ne.s32.totalorder %s554_s26, %s2760_s30  ;;  %p2769_p0 = scmp.lt.s32.totalorder %s2760_s30, %s2760_s30 }
  0x75   : > { %p2763_p11 = pnand %p2761_p10, %p3507_p8  ;;  %p2770_p2 = por %p2769_p0, %p2768_p13 }
  0x77   : > { %p2764_p12 = pneg %p2763_p11 }
  0x79   : > { %p2771_p5 = pnand %p2770_p2, %p2764_p12 }
  0x7b   : > { %2774 = shalt.err (!%p2771_p5)
}
  0x7c   : > { %2504 = dma.hbm_to_vmem [thread:$0]  (!%p3491_p6), %s4244_s7, 256, %s554_s26, [#allocation19], %s3324_s12, %s3324_s12, %s3325_s14  }
  0x7d   : > { %s3326_s20 = smov [#allocation21]   ;;  %s3327_s21 = smov [#allocation24]  }
  0x7e   : > { %s577_s16 = sshll.u32 %s3326_s20, 4  ;;  %s602_s25 = sshll.u32 %s3327_s21, 4  ;;  %s578_s16 = int_to_ptr.vmem [resolvable:$true] %s577_s16  ;;  %s603_s25 = int_to_ptr.vmem [resolvable:$true] %s602_s25 }
  0x7f   : > { %s4245_s9 = sld [smem:[#allocation59_spill]] }
  0x85   : > { %s2775_s22 = scalar_lea.hbm %s4245_s9, 256 }
  0x86   : > { %p2776_p7 = scmp.ne.s32.totalorder %s4245_s9, %s2775_s22  ;;  %p2782_p1 = scmp.lt.u32.totalorder %s2775_s22, %s4245_s9 }
  0x88   : > { %p2778_p9 = pnand %p2776_p7, %p3507_p8 }
  0x8a   : > { %p2779_p4 = pneg %p2778_p9 }
  0x8c   : > { %p2784_p3 = pnand %p2782_p1, %p2779_p4 }
  0x8e   : > { %2787 = shalt.err (!%p2784_p3)
}
  0x8f   : > { %s2788_s26 = scalar_lea.vmem %s578_s16, 256  ;;  %p2796_p13 = scmp.lt.s32.totalorder %s578_s16, %s578_s16 }
  0x90   : > { %p2789_p10 = scmp.ne.s32.totalorder %s578_s16, %s2788_s26  ;;  %p2797_p0 = scmp.lt.s32.totalorder %s2788_s26, %s2788_s26 }
  0x92   : > { %p2791_p11 = pnand %p2789_p10, %p3507_p8  ;;  %p2798_p2 = por %p2797_p0, %p2796_p13 }
  0x94   : > { %p2792_p12 = pneg %p2791_p11 }
  0x96   : > { %p2799_p5 = pnand %p2798_p2, %p2792_p12 }
  0x98   : > { %2802 = shalt.err (!%p2799_p5)
}
  0x99   : > { %2510 = dma.hbm_to_vmem [thread:$0]  (!%p3491_p6), %s4245_s9, 256, %s578_s16, [#allocation22], %s3324_s12, %s3324_s12, %s3325_s14  }
  0x9a   : > { %s4246_s11 = sld [smem:[#allocation61_spill]] }
  0xa0   : > { %s2803_s21 = scalar_lea.hbm %s4246_s11, 16 }
  0xa1   : > { %p2804_p7 = scmp.ne.s32.totalorder %s4246_s11, %s2803_s21  ;;  %p2810_p1 = scmp.lt.u32.totalorder %s2803_s21, %s4246_s11 }
  0xa3   : > { %p2806_p9 = pnand %p2804_p7, %p3507_p8 }
  0xa5   : > { %p2807_p4 = pneg %p2806_p9 }
  0xa7   : > { %p2812_p3 = pnand %p2810_p1, %p2807_p4 }
  0xa9   : > { %2815 = shalt.err (!%p2812_p3)
}
  0xaa   : > { %s2816_s3 = scalar_lea.vmem %s603_s25, 16  ;;  %s2823_s16 = scalar_lea.vmem %s603_s25, 32 }
  0xab   : > { %p2817_p10 = scmp.ne.s32.totalorder %s603_s25, %s2816_s3  ;;  %p2824_p13 = scmp.lt.s32.totalorder %s603_s25, %s603_s25 }
  0xac   : > { %p2825_p0 = scmp.lt.s32.totalorder %s2823_s16, %s2816_s3 }
  0xad   : > { %p2819_p11 = pnand %p2817_p10, %p3507_p8 }
  0xae   : > { %p2826_p2 = por %p2825_p0, %p2824_p13 }
  0xaf   : > { %p2820_p12 = pneg %p2819_p11 }
  0xb1   : > { %p2827_p5 = pnand %p2826_p2, %p2820_p12 }
  0xb3   : > { %2830 = shalt.err (!%p2827_p5)
}
  0xb4   : > { %2516 = dma.hbm_to_vmem [thread:$0]  (!%p3491_p6), %s4246_s11, 16, %s603_s25, [#allocation25]  }
  0xb5   : > { %s3328_s10 = smov [#allocation27]   ;;  %s3329_s20 = smov [#allocation30]  }
  0xb6   : > { %s623_s23 = sshll.u32 %s3328_s10, 4  ;;  %s647_s21 = sshll.u32 %s3329_s20, 4  ;;  %s624_s23 = int_to_ptr.vmem [resolvable:$true] %s623_s23  ;;  %s648_s21 = int_to_ptr.vmem [resolvable:$true] %s647_s21 }
  0xb7   : > { %s4247_s13 = sld [smem:[#allocation63_spill]] }
  0xbd   : > { %s2831_s22 = scalar_lea.hbm %s4247_s13, 256 }
  0xbe   : > { %p2832_p7 = scmp.ne.s32.totalorder %s4247_s13, %s2831_s22  ;;  %p2838_p1 = scmp.lt.u32.totalorder %s2831_s22, %s4247_s13 }
  0xc0   : > { %p2834_p9 = pnand %p2832_p7, %p3507_p8 }
  0xc2   : > { %p2835_p4 = pneg %p2834_p9 }
  0xc4   : > { %p2840_p3 = pnand %p2838_p1, %p2835_p4 }
  0xc6   : > { %2843 = shalt.err (!%p2840_p3)
}
  0xc7   : > { %s2844_s25 = scalar_lea.vmem %s624_s23, 256  ;;  %p2852_p13 = scmp.lt.s32.totalorder %s624_s23, %s624_s23 }
  0xc8   : > { %p2845_p10 = scmp.ne.s32.totalorder %s624_s23, %s2844_s25  ;;  %p2853_p0 = scmp.lt.s32.totalorder %s2844_s25, %s2844_s25 }
  0xca   : > { %p2847_p11 = pnand %p2845_p10, %p3507_p8  ;;  %p2854_p2 = por %p2853_p0, %p2852_p13 }
  0xcc   : > { %p2848_p12 = pneg %p2847_p11 }
  0xce   : > { %p2855_p5 = pnand %p2854_p2, %p2848_p12 }
  0xd0   : > { %2858 = shalt.err (!%p2855_p5)
}
  0xd1   : > { %2522 = dma.hbm_to_vmem [thread:$0]  (!%p3491_p6), %s4247_s13, 256, %s624_s23, [#allocation28], %s3324_s12, %s3324_s12, %s3325_s14  }
  0xd2   : > { %s4248_s15 = sld [smem:[#allocation65_spill]] }
  0xd8   : > { %s2859_s18 = scalar_lea.hbm %s4248_s15, 512 }
  0xd9   : > { %p2860_p7 = scmp.ne.s32.totalorder %s4248_s15, %s2859_s18  ;;  %p2866_p1 = scmp.lt.u32.totalorder %s2859_s18, %s4248_s15 }
  0xdb   : > { %p2862_p9 = pnand %p2860_p7, %p3507_p8 }
  0xdd   : > { %p2863_p4 = pneg %p2862_p9 }
  0xdf   : > { %p2868_p3 = pnand %p2866_p1, %p2863_p4 }
  0xe1   : > { %2871 = shalt.err (!%p2868_p3)
}
  0xe2   : > { %s2872_s26 = scalar_lea.vmem %s648_s21, 512  ;;  %p2880_p13 = scmp.lt.s32.totalorder %s648_s21, %s648_s21 }
  0xe3   : > { %p2873_p10 = scmp.ne.s32.totalorder %s648_s21, %s2872_s26  ;;  %p2881_p0 = scmp.lt.s32.totalorder %s2872_s26, %s2872_s26 }
  0xe5   : > { %p2875_p11 = pnand %p2873_p10, %p3507_p8  ;;  %p2882_p2 = por %p2881_p0, %p2880_p13 }
  0xe7   : > { %p2876_p12 = pneg %p2875_p11 }
  0xe9   : > { %p2883_p5 = pnand %p2882_p2, %p2876_p12 }
  0xeb   : > { %2886 = shalt.err (!%p2883_p5)
}
  0xec   : > { %2528 = dma.hbm_to_vmem [thread:$0]  (!%p3491_p6), %s4248_s15, 512, %s648_s21, [#allocation31], %s3324_s12, %s3324_s12, %s3325_s14  }
  0xed   : > { %s2209_s5 = sadd.s32 4294967294, %s3319_s19   ;;  %s60_s10 = sadd.s32 1, %s3315_s0 }
  0xee   : > { %s69_s20 = sadd.s32 1, %s3307_s29  ;;  %p62_p7 = scmp.ge.s32.totalorder %s60_s10, 2 }
  0xef   : > { %p76_p9 = scmp.ne.s32.totalorder %s3307_s29, %s3303_s28  ;;  %p77_p4 = scmp.eq.s32.totalorder %s3319_s19, 0 }
  0xf0   : > { %p82_p1 = scmp.ne.s32.totalorder %s3303_s28, %s3299_s27  ;;  %s4302_s10 = smov (%p62_p7, %s60_s10), 0 }
  0xf1   : > { %4249 = sst [smem:[#allocation49_spill]] %s4302_s10  ;;  %p78_p3 = por %p77_p4, %p76_p9 }
  0xf2   : > { %p4250_p10 = scmp.eq.s32.totalorder %s3477_s1, 0  ;;  %s64_s12 = ssub.s32 %s3315_s0, %s4302_s10 }
  0xf3   : > { %p454_p12 = scmp.eq.s32.totalorder %s3477_s1, 1  ;;  %p67_p13 = scmp.eq.s32.totalorder %s64_s12, 0 }
  0xf4   : > { %p3664_p11 = por %p4250_p10, %p82_p1  ;;  %p460_p0 = scmp.eq.s32.totalorder %s2209_s5, 1 }
  0xf5   : > { %p3671_p2 = por %p454_p12, %p76_p9  ;;  %p2563_p5 = scmp.lt.s32.totalorder %s3319_s19, 2 }
  0xf6   : > { %s4251_s17 = scalar_select %p3664_p11, 1, 0 }
  0xf7   : > { %s4252_s14 = scalar_select %p3671_p2, 1, 0 }
  0xf8   : > { %s3677_s21 = scalar_select %p67_p13, %s3307_s29, %s69_s20  }
  0xf9   : > { %p3679_p7 = por %p460_p0, %p82_p1  ;;  %s3684_s22 = sand.u32 1, %s3307_s29  }
  0xfa   : > { %p3686_p4 = pnand %p2563_p5, %p78_p3  ;;  %s691_s3 = sand.u32 1, %s3319_s19  }
  0xfb   : > { %s4253_s18 = scalar_select %p3679_p7, 1, 0 }
  0xfc   : > { %s4254_s30 = scalar_select %p3686_p4, 1, 0 }
  0xfd   : > { %s2228_s16 = sshll.u32 %s3684_s22, 2  ;;  %s2229_s26 = sshll.u32 %s3315_s0, 6 }
  0xfe   : > { %s695_s23 = scalar_lea.vmem [#allocation9], %s2228_s16  ;;  %s4255_s12 = sld [smem:[#allocation51_spill]] }
  0xff   : > { %s702_s25 = sshll.u32 %s695_s23, 4  ;;  %s3700_s9 = scalar_lea.sflag [#allocation10], %s691_s3  ;;  %s3698_s25 = int_to_ptr.vmem [resolvable:$true] %s702_s25 }
 0x100   : > { %p3706_p1 = pneg %p3686_p4 }
 0x102   : > { %s4256_s13 = scalar_select %p3706_p1, 1, 0 }
 0x104   : > { %s3696_s7 = scalar_lea.hbm %s4255_s12, %s2229_s26  ;;  %s2892_s23 = scalar_lea.hbm %s4255_s12, 128 }
 0x105   : > { %s2887_s11 = scalar_lea.hbm %s3696_s7, 64  ;;  %p2893_p12 = scmp.lt.u32.totalorder %s3696_s7, %s4255_s12 }
 0x106   : > { %p2888_p9 = scmp.ne.s32.totalorder %s3696_s7, %s2887_s11  ;;  %p2894_p13 = scmp.lt.u32.totalorder %s2892_s23, %s2887_s11 }
 0x107   : > { %p2896_p5 = scmp.lt.u32.totalorder %s2887_s11, %s3696_s7 }
 0x108   : > { %p2890_p3 = pnand %p3706_p1, %p2888_p9  ;;  %p2895_p0 = por %p2894_p13, %p2893_p12 }
 0x10a   : > { %p2891_p10 = pneg %p2890_p3  ;;  %p2897_p7 = por %p2896_p5, %p2895_p0 }
 0x10c   : > { %p2898_p2 = pnand %p2897_p7, %p2891_p10 }
 0x10e   : > { %2901 = shalt.err (!%p2898_p2)
}
 0x10f   : > { %s2902_s3 = scalar_lea.vmem %s3698_s25, 64  ;;  %s3330_s16 = smov [#allocation9]  }
 0x110   : > { %p2903_p9 = scmp.ne.s32.totalorder %s3698_s25, %s2902_s3  ;;  %s2907_s26 = sshll.u32 %s3330_s16, 4  ;;  %s2908_s26 = int_to_ptr.vmem [resolvable:$false] %s2907_s26 }
 0x111   : > { %s2909_s5 = scalar_lea.vmem %s2908_s26, 128  ;;  %p2910_p6 = scmp.lt.s32.totalorder %s3698_s25, %s2908_s26 }
 0x112   : > { %p2905_p3 = pnand %p2903_p9, %p3706_p1  ;;  %p2911_p8 = scmp.lt.s32.totalorder %s2909_s5, %s2902_s3 }
 0x114   : > { %p2906_p11 = pneg %p2905_p3  ;;  %p2912_p12 = por %p2911_p8, %p2910_p6 }
 0x116   : > { %p2913_p13 = pnand %p2912_p12, %p2906_p11 }
 0x118   : > { %2916 = shalt.err (!%p2913_p13)
}
 0x119   : > { %2538 = dma.hbm_to_vmem [thread:$0]  (!%p3686_p4), %s3696_s7, 64, %s3698_s25, %s3700_s9  }
 0x11a   : > { %s3331_s11 = smov [#allocation14]   ;;  %s3332_s20 = smov [#allocation17]  }
 0x11b   : > { %s519_s23 = sshll.u32 %s3331_s11, 4  ;;  %s543_s12 = sshll.u32 %s3332_s20, 4  ;;  %s520_s23 = int_to_ptr.vmem [resolvable:$true] %s519_s23  ;;  %s3730_s12 = int_to_ptr.vmem [resolvable:$true] %s543_s12 }
 0x11c   : > { %s4257_s4 = sld [smem:[#allocation54_spill]]  ;;  %p4258_p8 = scmp.ne.s32.totalorder %s4242_s2, 0 }
 0x122   : > { %s2917_s3 = scalar_lea.hbm %s4257_s4, 16 }
 0x123   : > { %p2918_p6 = scmp.ne.s32.totalorder %s4257_s4, %s2917_s3  ;;  %p2924_p7 = scmp.lt.u32.totalorder %s2917_s3, %s4257_s4 }
 0x125   : > { %p2920_p11 = pnand %p2918_p6, %p4258_p8 }
 0x127   : > { %p2921_p2 = pneg %p2920_p11 }
 0x129   : > { %p2926_p10 = pnand %p2924_p7, %p2921_p2 }
 0x12b   : > { %2929 = shalt.err (!%p2926_p10)
}
 0x12c   : > { %s2930_s25 = scalar_lea.vmem %s520_s23, 16  ;;  %s2937_s11 = scalar_lea.vmem %s520_s23, 32 }
 0x12d   : > { %p2931_p0 = scmp.ne.s32.totalorder %s520_s23, %s2930_s25  ;;  %p2938_p3 = scmp.lt.s32.totalorder %s520_s23, %s520_s23 }
 0x12e   : > { %p2939_p12 = scmp.lt.s32.totalorder %s2937_s11, %s2930_s25 }
 0x12f   : > { %p2933_p5 = pnand %p2931_p0, %p4258_p8 }
 0x130   : > { %p2940_p13 = por %p2939_p12, %p2938_p3 }
 0x131   : > { %p2934_p9 = pneg %p2933_p5 }
 0x133   : > { %p2941_p4 = pnand %p2940_p13, %p2934_p9 }
 0x135   : > { %2944 = shalt.err (!%p2941_p4)
}
 0x136   : > { %p4259_p6 = scmp.ne.s32.totalorder %s4240_s24, 0  ;;  %s4260_s6 = sld [smem:[#allocation56_spill]] }
 0x138   : > { %2495 = dma.hbm_to_vmem [thread:$0]  (!%p4259_p6), %s4257_s4, 16, %s520_s23, [#allocation13]  }
 0x13c   : > { %s2945_s26 = scalar_lea.hbm %s4260_s6, 16 }
 0x13d   : > { %p2946_p11 = scmp.ne.s32.totalorder %s4260_s6, %s2945_s26  ;;  %p2952_p4 = scmp.lt.u32.totalorder %s2945_s26, %s4260_s6 }
 0x13f   : > { %p2948_p2 = pnand %p2946_p11, %p4258_p8 }
 0x141   : > { %p2949_p7 = pneg %p2948_p2 }
 0x143   : > { %p2954_p10 = pnand %p2952_p4, %p2949_p7 }
 0x145   : > { %2957 = shalt.err (!%p2954_p10)
}
 0x146   : > { %s2958_s23 = scalar_lea.vmem %s3730_s12, 16  ;;  %s2965_s11 = scalar_lea.vmem %s3730_s12, 32 }
 0x147   : > { %p2959_p0 = scmp.ne.s32.totalorder %s3730_s12, %s2958_s23  ;;  %p2966_p3 = scmp.lt.s32.totalorder %s3730_s12, %s3730_s12 }
 0x148   : > { %p2967_p12 = scmp.lt.s32.totalorder %s2965_s11, %s2958_s23 }
 0x149   : > { %p2961_p5 = pnand %p2959_p0, %p4258_p8 }
 0x14a   : > { %p2968_p13 = por %p2967_p12, %p2966_p3 }
 0x14b   : > { %p2962_p9 = pneg %p2961_p5 }
 0x14d   : > { %p2969_p11 = pnand %p2968_p13, %p2962_p9 }
 0x14f   : > { %2972 = shalt.err (!%p2969_p11)
}
 0x150   : > { %2501 = dma.hbm_to_vmem [thread:$0]  (!%p4259_p6), %s4260_s6, 16, %s3730_s12, [#allocation16]  }
 0x151   : > { %s3333_s10 = smov [#allocation20]   ;;  %s3334_s26 = smov [#allocation23]  }
 0x152   : > { %s567_s16 = sshll.u32 %s3333_s10, 4  ;;  %s591_s3 = sshll.u32 %s3334_s26, 4  ;;  %s568_s16 = int_to_ptr.vmem [resolvable:$true] %s567_s16  ;;  %s3774_s3 = int_to_ptr.vmem [resolvable:$true] %s591_s3 }
 0x153   : > { %s4261_s8 = sld [smem:[#allocation58_spill]] }
 0x159   : > { %s2973_s25 = scalar_lea.hbm %s4261_s8, 16 }
 0x15a   : > { %p2974_p2 = scmp.ne.s32.totalorder %s4261_s8, %s2973_s25  ;;  %p2980_p10 = scmp.lt.u32.totalorder %s2973_s25, %s4261_s8 }
 0x15c   : > { %p2976_p7 = pnand %p2974_p2, %p4258_p8 }
 0x15e   : > { %p2977_p4 = pneg %p2976_p7 }
 0x160   : > { %p2982_p0 = pnand %p2980_p10, %p2977_p4 }
 0x162   : > { %2985 = shalt.err (!%p2982_p0)
}
 0x163   : > { %s2986_s20 = scalar_lea.vmem %s568_s16, 16  ;;  %s2993_s10 = scalar_lea.vmem %s568_s16, 32 }
 0x164   : > { %p2987_p5 = scmp.ne.s32.totalorder %s568_s16, %s2986_s20  ;;  %p2994_p12 = scmp.lt.s32.totalorder %s568_s16, %s568_s16 }
 0x165   : > { %p2995_p13 = scmp.lt.s32.totalorder %s2993_s10, %s2986_s20 }
 0x166   : > { %p2989_p9 = pnand %p2987_p5, %p4258_p8 }
 0x167   : > { %p2996_p11 = por %p2995_p13, %p2994_p12 }
 0x168   : > { %p2990_p3 = pneg %p2989_p9 }
 0x16a   : > { %p2997_p1 = pnand %p2996_p11, %p2990_p3 }
 0x16c   : > { %3000 = shalt.err (!%p2997_p1)
}
 0x16d   : > { %2507 = dma.hbm_to_vmem [thread:$0]  (!%p4259_p6), %s4261_s8, 16, %s568_s16, [#allocation19]  }
 0x16e   : > { %s4262_s23 = sld [smem:[#allocation60_spill]] }
 0x174   : > { %s3001_s11 = scalar_lea.hbm %s4262_s23, 16 }
 0x175   : > { %p3002_p2 = scmp.ne.s32.totalorder %s4262_s23, %s3001_s11  ;;  %p3008_p1 = scmp.lt.u32.totalorder %s3001_s11, %s4262_s23 }
 0x177   : > { %p3004_p7 = pnand %p3002_p2, %p4258_p8 }
 0x179   : > { %p3005_p4 = pneg %p3004_p7 }
 0x17b   : > { %p3010_p10 = pnand %p3008_p1, %p3005_p4 }
 0x17d   : > { %3013 = shalt.err (!%p3010_p10)
}
 0x17e   : > { %s3014_s16 = scalar_lea.vmem %s3774_s3, 16  ;;  %s3021_s26 = scalar_lea.vmem %s3774_s3, 32 }
 0x17f   : > { %p3015_p0 = scmp.ne.s32.totalorder %s3774_s3, %s3014_s16  ;;  %p3022_p3 = scmp.lt.s32.totalorder %s3774_s3, %s3774_s3 }
 0x180   : > { %p3023_p12 = scmp.lt.s32.totalorder %s3021_s26, %s3014_s16 }
 0x181   : > { %p3017_p5 = pnand %p3015_p0, %p4258_p8 }
 0x182   : > { %p3024_p13 = por %p3023_p12, %p3022_p3 }
 0x183   : > { %p3018_p9 = pneg %p3017_p5 }
 0x185   : > { %p3025_p11 = pnand %p3024_p13, %p3018_p9 }
 0x187   : > { %3028 = shalt.err (!%p3025_p11)
}
 0x188   : > { %2513 = dma.hbm_to_vmem [thread:$0]  (!%p4259_p6), %s4262_s23, 16, %s3774_s3, [#allocation22]  }
 0x189   : > { %s3335_s25 = smov [#allocation26]   ;;  %s3336_s15 = smov [#allocation29]  }
 0x18a   : > { %s613_s11 = sshll.u32 %s3335_s25, 4  ;;  %s637_s12 = sshll.u32 %s3336_s15, 4  ;;  %s614_s11 = int_to_ptr.vmem [resolvable:$true] %s613_s11  ;;  %s3818_s12 = int_to_ptr.vmem [resolvable:$true] %s637_s12 }
 0x18b   : > { %s4263_s16 = sld [smem:[#allocation62_spill]] }
 0x191   : > { %s3029_s26 = scalar_lea.hbm %s4263_s16, 16 }
 0x192   : > { %p3030_p2 = scmp.ne.s32.totalorder %s4263_s16, %s3029_s26  ;;  %p3036_p1 = scmp.lt.u32.totalorder %s3029_s26, %s4263_s16 }
 0x194   : > { %p3032_p7 = pnand %p3030_p2, %p4258_p8 }
 0x196   : > { %p3033_p4 = pneg %p3032_p7 }
 0x198   : > { %p3038_p10 = pnand %p3036_p1, %p3033_p4 }
 0x19a   : > { %3041 = shalt.err (!%p3038_p10)
}
 0x19b   : > { %s3042_s7 = scalar_lea.vmem %s614_s11, 16  ;;  %s3049_s25 = scalar_lea.vmem %s614_s11, 32 }
 0x19c   : > { %p3043_p0 = scmp.ne.s32.totalorder %s614_s11, %s3042_s7  ;;  %p3050_p3 = scmp.lt.s32.totalorder %s614_s11, %s614_s11 }
 0x19d   : > { %p3051_p12 = scmp.lt.s32.totalorder %s3049_s25, %s3042_s7 }
 0x19e   : > { %p3045_p5 = pnand %p3043_p0, %p4258_p8 }
 0x19f   : > { %p3052_p13 = por %p3051_p12, %p3050_p3 }
 0x1a0   : > { %p3046_p9 = pneg %p3045_p5 }
 0x1a2   : > { %p3053_p11 = pnand %p3052_p13, %p3046_p9 }
 0x1a4   : > { %3056 = shalt.err (!%p3053_p11)
}
 0x1a5   : > { %2519 = dma.hbm_to_vmem [thread:$0]  (!%p4259_p6), %s4263_s16, 16, %s614_s11, [#allocation25]  }
 0x1a6   : > { %s4264_s10 = sld [smem:[#allocation64_spill]] }
 0x1ac   : > { %s3057_s26 = scalar_lea.hbm %s4264_s10, 16 }
 0x1ad   : > { %p3058_p2 = scmp.ne.s32.totalorder %s4264_s10, %s3057_s26  ;;  %p3064_p1 = scmp.lt.u32.totalorder %s3057_s26, %s4264_s10 }
 0x1af   : > { %p3060_p7 = pnand %p3058_p2, %p4258_p8 }
 0x1b1   : > { %p3061_p4 = pneg %p3060_p7 }
 0x1b3   : > { %p3066_p10 = pnand %p3064_p1, %p3061_p4 }
 0x1b5   : > { %3069 = shalt.err (!%p3066_p10)
}
 0x1b6   : > { %s3070_s11 = scalar_lea.vmem %s3818_s12, 16  ;;  %s3077_s4 = scalar_lea.vmem %s3818_s12, 32 }
 0x1b7   : > { %p3071_p0 = scmp.ne.s32.totalorder %s3818_s12, %s3070_s11  ;;  %p3078_p3 = scmp.lt.s32.totalorder %s3818_s12, %s3818_s12 }
 0x1b8   : > { %p3079_p12 = scmp.lt.s32.totalorder %s3077_s4, %s3070_s11 }
 0x1b9   : > { %p3073_p5 = pnand %p3071_p0, %p4258_p8 }
 0x1ba   : > { %p3080_p13 = por %p3079_p12, %p3078_p3 }
 0x1bb   : > { %p3074_p9 = pneg %p3073_p5 }
 0x1bd   : > { %p3081_p11 = pnand %p3080_p13, %p3074_p9 }
 0x1bf   : > { %3084 = shalt.err (!%p3081_p11)
}
 0x1c0   : > { %2525 = dma.hbm_to_vmem [thread:$0]  (!%p4259_p6), %s4264_s10, 16, %s3818_s12, [#allocation28]  }
 0x1c1   : > { %s3337_s20 = smov [#allocation32]   ;;  %s2226_s5 = sshll.u32 %s3684_s22, 3 }
 0x1c2   : > { %s661_s26 = sshll.u32 %s3337_s20, 4  ;;  %s4265_s25 = sld [smem:[#allocation66_spill]]  ;;  %s662_s26 = int_to_ptr.vmem [resolvable:$true] %s661_s26 }
 0x1c8   : > { %s3085_s11 = scalar_lea.hbm %s4265_s25, 16 }
 0x1c9   : > { %p3086_p2 = scmp.ne.s32.totalorder %s4265_s25, %s3085_s11  ;;  %p3092_p1 = scmp.lt.u32.totalorder %s3085_s11, %s4265_s25 }
 0x1cb   : > { %p3088_p7 = pnand %p3086_p2, %p4258_p8 }
 0x1cd   : > { %p3089_p4 = pneg %p3088_p7 }
 0x1cf   : > { %p3094_p10 = pnand %p3092_p1, %p3089_p4 }
 0x1d1   : > { %3097 = shalt.err (!%p3094_p10)
}
 0x1d2   : > { %s3098_s12 = scalar_lea.vmem %s662_s26, 16  ;;  %s3105_s15 = scalar_lea.vmem %s662_s26, 32 }
 0x1d3   : > { %p3099_p0 = scmp.ne.s32.totalorder %s662_s26, %s3098_s12  ;;  %p3106_p3 = scmp.lt.s32.totalorder %s662_s26, %s662_s26 }
 0x1d4   : > { %p3107_p12 = scmp.lt.s32.totalorder %s3105_s15, %s3098_s12 }
 0x1d5   : > { %p3101_p5 = pnand %p3099_p0, %p4258_p8 }
 0x1d6   : > { %p3108_p13 = por %p3107_p12, %p3106_p3 }
 0x1d7   : > { %p3102_p9 = pneg %p3101_p5 }
 0x1d9   : > { %p3109_p11 = pnand %p3108_p13, %p3102_p9 }
 0x1db   : > { %3112 = shalt.err (!%p3109_p11)
}
 0x1dc   : > { %2531 = dma.hbm_to_vmem [thread:$0]  (!%p4259_p6), %s4265_s25, 16, %s662_s26, [#allocation31]  }
 0x1dd   : > { %s2227_s16 = sshll.u32 %s3315_s0, 7  ;;  %s676_s3 = scalar_lea.vmem [#allocation6], %s2226_s5 }
 0x1de   : > { %s684_s2 = sshll.u32 %s676_s3, 4  ;;  %s4266_s4 = sld [smem:[#allocation50_spill]]  ;;  %s685_s2 = int_to_ptr.vmem [resolvable:$true] %s684_s2 }
 0x1df   : > { %s673_s24 = scalar_lea.sflag [#allocation7], %s3684_s22  ;;  %p4267_p2 = scmp.ne.s32.totalorder %s4256_s13, 0 }
 0x1e4   : > { %s3885_s6 = scalar_lea.hbm %s4266_s4, %s2227_s16  ;;  %s3118_s5 = scalar_lea.hbm %s4266_s4, 256 }
 0x1e5   : > { %s3113_s12 = scalar_lea.hbm %s3885_s6, 128  ;;  %p3119_p6 = scmp.lt.u32.totalorder %s3885_s6, %s4266_s4 }
 0x1e6   : > { %p3114_p8 = scmp.ne.s32.totalorder %s3885_s6, %s3113_s12  ;;  %p3120_p1 = scmp.lt.u32.totalorder %s3118_s5, %s3113_s12 }
 0x1e7   : > { %p3122_p0 = scmp.lt.u32.totalorder %s3113_s12, %s3885_s6 }
 0x1e8   : > { %p3116_p7 = pnand %p3114_p8, %p4267_p2  ;;  %p3121_p10 = por %p3120_p1, %p3119_p6 }
 0x1ea   : > { %p3117_p4 = pneg %p3116_p7  ;;  %p3123_p5 = por %p3122_p0, %p3121_p10 }
 0x1ec   : > { %p3124_p9 = pnand %p3123_p5, %p3117_p4 }
 0x1ee   : > { %3127 = shalt.err (!%p3124_p9)
}
 0x1ef   : > { %s3128_s16 = scalar_lea.vmem %s685_s2, 128  ;;  %s3338_s3 = smov [#allocation6]  }
 0x1f0   : > { %p3129_p3 = scmp.ne.s32.totalorder %s685_s2, %s3128_s16  ;;  %s3133_s7 = sshll.u32 %s3338_s3, 4  ;;  %s3134_s7 = int_to_ptr.vmem [resolvable:$false] %s3133_s7 }
 0x1f1   : > { %s3135_s11 = scalar_lea.vmem %s3134_s7, 256  ;;  %p3136_p11 = scmp.lt.s32.totalorder %s685_s2, %s3134_s7 }
 0x1f2   : > { %p3131_p12 = pnand %p3129_p3, %p4267_p2  ;;  %p3137_p8 = scmp.lt.s32.totalorder %s3135_s11, %s3128_s16 }
 0x1f4   : > { %p3132_p13 = pneg %p3131_p12  ;;  %p3138_p7 = por %p3137_p8, %p3136_p11 }
 0x1f6   : > { %p3139_p1 = pnand %p3138_p7, %p3132_p13 }
 0x1f8   : > { %3142 = shalt.err (!%p3139_p1)
}
 0x1f9   : > { %p4268_p6 = scmp.ne.s32.totalorder %s4254_s30, 0  ;;  %s2230_s12 = sshll.u32 %s3315_s0, 4 }
 0x1fa   : > { %s4269_s5 = sld [smem:[#allocation52_spill]]  ;;  %s712_s20 = scalar_lea.vmem [#allocation11], %s3684_s22 }
 0x1fb   : > { %2535 = dma.hbm_to_vmem [thread:$0]  (!%p4268_p6), %s3885_s6, 128, %s685_s2, %s673_s24  }
 0x1fc   : > { %s719_s16 = sshll.u32 %s712_s20, 4  ;;  %s720_s16 = int_to_ptr.vmem [resolvable:$true] %s719_s16 }
 0x200   : > { %s3909_s8 = scalar_lea.hbm %s4269_s5, %s2230_s12  ;;  %s3148_s6 = scalar_lea.hbm %s4269_s5, 32 }
 0x201   : > { %s3143_s3 = scalar_lea.hbm %s3909_s8, 16  ;;  %p3149_p5 = scmp.lt.u32.totalorder %s3909_s8, %s4269_s5 }
 0x202   : > { %p3144_p4 = scmp.ne.s32.totalorder %s3909_s8, %s3143_s3  ;;  %p3150_p9 = scmp.lt.u32.totalorder %s3148_s6, %s3143_s3 }
 0x203   : > { %p3152_p12 = scmp.lt.u32.totalorder %s3143_s3, %s3909_s8 }
 0x204   : > { %p3146_p10 = pnand %p3144_p4, %p4267_p2  ;;  %p3151_p3 = por %p3150_p9, %p3149_p5 }
 0x206   : > { %p3147_p0 = pneg %p3146_p10  ;;  %p3153_p13 = por %p3152_p12, %p3151_p3 }
 0x208   : > { %p3154_p11 = pnand %p3153_p13, %p3147_p0 }
 0x20a   : > { %3157 = shalt.err (!%p3154_p11)
}
 0x20b   : > { %s3158_s22 = scalar_lea.vmem %s720_s16, 16  ;;  %s3339_s12 = smov [#allocation11]  }
 0x20c   : > { %p3159_p8 = scmp.ne.s32.totalorder %s720_s16, %s3158_s22  ;;  %s3163_s26 = sshll.u32 %s3339_s12, 4  ;;  %s3164_s26 = int_to_ptr.vmem [resolvable:$false] %s3163_s26 }
 0x20d   : > { %s3165_s15 = scalar_lea.vmem %s3164_s26, 32  ;;  %p3166_p4 = scmp.lt.s32.totalorder %s720_s16, %s3164_s26 }
 0x20e   : > { %p3161_p7 = pnand %p3159_p8, %p4267_p2  ;;  %p3167_p10 = scmp.lt.s32.totalorder %s3165_s15, %s3158_s22 }
 0x210   : > { %p3162_p1 = pneg %p3161_p7  ;;  %p3168_p6 = por %p3167_p10, %p3166_p4 }
 0x212   : > { %p3169_p5 = pnand %p3168_p6, %p3162_p1 }
 0x214   : > { %3172 = shalt.err (!%p3169_p5)
}
 0x215   : > { %p4270_p9 = scmp.ne.s32.totalorder %s4254_s30, 0  ;;  %s4271_s20 = sld [smem:[#allocation48_spill]] }
 0x217   : > { %2541 = dma.hbm_to_vmem [thread:$0]  (!%p4270_p9), %s3909_s8, 16, %s720_s16, %s3700_s9  }
 0x21b   : > { %p4272_p0 = scmp.ne.s32.totalorder %s4271_s20, 0 }
 0x21c   : > { %s3933_s13 = sand.u32 (!%p4272_p0), 1, %s3303_s28   ;;  %p4273_p2 = scmp.ne.s32.totalorder (!%p4272_p0), %s4251_s17, 0 }
 0x21d   : > { %728 = sbr.rel (%p4272_p0) target bundleno = 3191 (0xc77), region = 88  ;;  %s2232_s3 = sshll.u32 (!%p4272_p0), %s3933_s13, 3 }
 0x21e   : > { %s731_s7 = scalar_lea.sflag (!%p4272_p0), [#allocation7], %s3933_s13  ;;  %s734_s2 = scalar_lea.vmem (!%p4272_p0), [#allocation6], %s2232_s3 }
 0x224   : > { %3254 = dma.done.wait (%p4273_p2), %s731_s7, 128  }
 0x225   : > { %3256 = vsyncadd (%p4273_p2), %s731_s7, 4294967168  ;;  %s739_s9 = sand.u32 1, %s3477_s1   ;;  %s2233_s30 = sshll.u32 %s3933_s13, 2 }
 0x226   : > { %s740_s8 = scalar_lea.sflag [#allocation10], %s739_s9  ;;  %s743_s16 = scalar_lea.vmem [#allocation9], %s2233_s30 }
 0x227   : > { %3258 = dma.done.wait (%p4273_p2), %s740_s8, 80  }
 0x228   : > { %3260 = vsyncadd (%p4273_p2), %s740_s8, 4294967216  ;;  %s751_s6 = scalar_lea.vmem [#allocation11], %s3933_s13  ;;  %p4274_p6 = scmp.eq.s32.totalorder %s3477_s1, 0 }
 0x22a   : > { %3262 = dma.done.wait (%p4274_p6), [#allocation13], 32   ;;  %p4275_p3 = pmov %p4274_p6 }
 0x22c   : > { %3264 = vsyncadd (%p4275_p3), [#allocation13], 4294967264  ;;  %p4276_p12 = pmov %p4275_p3 }
 0x22d   : > { %p4277_p13 = pmov %p4275_p3 }
 0x22e   : > { %3266 = dma.done.wait (%p4276_p12), [#allocation16], 272  }
 0x22f   : > { %3268 = vsyncadd (%p4277_p13), [#allocation16], 4294967024  ;;  %p4278_p11 = pmov %p4275_p3 }
 0x230   : > { %p4279_p8 = pmov %p4275_p3 }
 0x231   : > { %3270 = dma.done.wait (%p4278_p11), [#allocation19], 272  }
 0x232   : > { %3272 = vsyncadd (%p4279_p8), [#allocation19], 4294967024  ;;  %p4280_p7 = pmov %p4275_p3 }
 0x233   : > { %p4281_p1 = pmov %p4275_p3 }
 0x234   : > { %3274 = dma.done.wait (%p4280_p7), [#allocation22], 272  }
 0x235   : > { %3276 = vsyncadd (%p4281_p1), [#allocation22], 4294967024  ;;  %p4282_p4 = pmov %p4281_p1 }
 0x236   : > { %p4283_p10 = pmov %p4281_p1 }
 0x237   : > { %3278 = dma.done.wait (%p4282_p4), [#allocation25], 32  }
 0x238   : > { %3280 = vsyncadd (%p4283_p10), [#allocation25], 4294967264  ;;  %p4284_p5 = pmov %p4281_p1 }
 0x239   : > { %p4285_p9 = pmov %p4281_p1 }
 0x23a   : > { %3282 = dma.done.wait (%p4284_p5), [#allocation28], 272  }
 0x23b   : > { %3284 = vsyncadd (%p4285_p9), [#allocation28], 4294967024  ;;  %p4286_p0 = pmov %p4281_p1 }
 0x23d   : > { %3286 = dma.done.wait (%p4286_p0), [#allocation31], 528   ;;  %p4287_p2 = pmov %p4286_p0 }
 0x23e   : > { %v879_v0 = vld [vmem:[%s743_s16] sm:$0xf]  ;;  %vm883_vm0 = vcmask 261120   ;;  %v3980_v1 = vld [vmem:[%s734_s2] sm:$0xff]  ;;  %v3340_v16 = vmov 0.0   ;;  %v2653_v17 = vld [vmem:[#allocation18 + $0x8] sm:$0xff]  }
 0x23f   : > { %3288 = vsyncadd (%p4287_p2), [#allocation31], 4294966768  ;;  %v880_v2 = vunpack.c.l.bf16 %v879_v0  ;;  %v1029_v4 = vsel %vm883_vm0, %v3980_v1, 0.0  ;;  %v2652_v15 = vld [vmem:[#allocation18] sm:$0xff]   ;;  %2331 = vmatprep.subr.bf16.mxu1 %v3340_v16  ;;  %2347 = vmatprep.subr.bf16.mxu0 %v3340_v16  ;;  %vm3341_vm1 = vmmov 0   ;;  %v2654_v32 = vld [vmem:[#allocation15] sm:$0xff]  }
 0x240   : > { %2332 = vmatpush3.bf16.msra.mxu1 %v2652_v15  ;;  %2335 = vmatprep.mubr.msk.bf16.mxu1 %vm3341_vm1, %v3340_v16  ;;  %v2250_v25 = vld [vmem:[#allocation12] ss:$0 sm:$0xff]  ;;  %v2251_v27 = vld [vmem:[#allocation14] ss:$0 sm:$0xff]  ;;  %v2655_v35 = vld [vmem:[#allocation15 + $0x8] sm:$0xff]   ;;  %vm1013_vm2 = vcmask 64512  }
 0x241   : > { %v884_v3 = vsel %vm883_vm0, %v880_v2, 0.0  ;;  %2333 = vmatprep.subr.bf16.mxu1 %v3340_v16  ;;  %2349 = vmatprep.mubr.msk.bf16.mxu0 %vm3341_vm1, %v3340_v16  ;;  %v2252_v38 = vld [vmem:[#allocation20] ss:$0 sm:$0xff]  ;;  %v2259_v44 = vld [vmem:[#allocation17] ss:$0 sm:$0xff]  ;;  %1127 = vst.msk [vmem:[#allocation5] sm:$0xff] %vm1013_vm2, %v3340_v16 }
 0x242   : > { %885 = vadd.xlane.f32.xlu0 %v884_v3  ;;  %s3342_s1 = smov 120   ;;  %s3343_s17 = smov 112   ;;  %vm1132_vm3 = vcmask 1043456   ;;  %vm1023_vm4 = vcmask 257024   ;;  %vm1627_vm5 = vcmask 60416   ;;  %vm1372_vm6 = vcmask 130112  }
 0x243   : > { %s3344_s24 = smov 104   ;;  %s3345_s11 = smov 96   ;;  %vm1496_vm7 = vcmask 195712   ;;  %vm1622_vm8 = vcmask 261312   ;;  %vm1843_vm9 = vcmask 523264  }
 0x244   : > { %2334 = vmatpush3.bf16.msra.mxu1 %v2653_v17  ;;  %s4075_s22 = scalar_lea.vmem [#allocation34], %s2233_s30  ;;  %s3346_s12 = smov 8  }
 0x245   : > { %2339 = vmatprep.subr.bf16.mxu1 %v3340_v16  ;;  %s3347_s26 = smov 16   ;;  %s3348_s15 = smov 24  }
 0x246   : > { %1030 = vadd.xlane.f32.xlu0 %v1029_v4  ;;  %s4288_s20 = sld [smem:[#allocation47_spill]]  ;;  %s4289_s30 = sld [smem:[#allocation68_spill]] }
 0x247   : > { %p4291_p3 = scmp.ne.s32.totalorder %s4252_s14, 0 }
 0x24c   : > { %s2294_s7 = sshll.u32 %s4288_s20, 6  ;;  %s4290_s8 = smov %s4289_s30 }
 0x24d   : > { %s4096_s16 = scalar_lea.hbm %s4289_s30, %s2294_s7 }
 0x2cf   : > { %v886_v5 = vpop.xlane.xlu0 %885 }
 0x2d0   : > { %v888_v6 = vmul.f32 0.03125, %v886_v5 }
 0x2d2   : > { %v889_v7 = vsub.f32 %v880_v2, %v888_v6 }
 0x2d3   : > { %v1031_v8 = vpop.xlane.xlu0 %1030 }
 0x2d4   : > { %v1033_v9 = vmul.f32 0.03125, %v1031_v8  ;;  %v890_v10 = vmul.f32 %v889_v7, %v889_v7  ;;  %v2264_v8 = vld [vmem:[%s751_s6] ss:$0 sm:$0xff]  ;;  %s1922_s6 = sshll.u32 %s4075_s22, 4  ;;  %s1923_s6 = int_to_ptr.vmem [resolvable:$true] %s1922_s6 }
 0x2d6   : > { %v1034_v11 = vsub.f32 %v3980_v1, %v1033_v9  ;;  %v891_v12 = vsel %vm883_vm0, %v890_v10, 0.0 }
 0x2d7   : > { %892 = vadd.xlane.f32.xlu1 %v891_v12 }
 0x2d8   : > { %v1035_v13 = vmul.f32 %v1034_v11, %v1034_v11 }
 0x2da   : > { %v1036_v14 = vsel %vm883_vm0, %v1035_v13, 0.0 }
 0x2db   : > { %1037 = vadd.xlane.f32.xlu1 %v1036_v14 }
 0x364   : > { %v893_v18 = vpop.xlane.xlu1 %892 }
 0x365   : > { %v894_v19 = vmul.f32 0.03125, %v893_v18 }
 0x367   : > { %v895_v20 = vadd.f32 1e-05, %v894_v19 }
 0x368   : > { %v1038_v21 = vpop.xlane.xlu1 %1037 }
 0x369   : > { %2667 = vrsqrt.f32 %v895_v20  ;;  %v1039_v22 = vmul.f32 0.03125, %v1038_v21 }
 0x36b   : > { %v1040_v23 = vadd.f32 1e-05, %v1039_v22 }
 0x36d   : > { %2669 = vrsqrt.f32 %v1040_v23 }
 0x373   : > { %v2668_v24 = vpop.eup %2667 }
 0x374   : > { %v897_v26 = vmul.f32 %v2668_v24, %v889_v7 }
 0x376   : > { %v904_v28 = vmul.f32 %v2250_v25, %v897_v26 }
 0x377   : > { %v2670_v29 = vpop.eup %2669 }
 0x378   : > { %v1042_v30 = vmul.f32 %v2670_v29, %v1034_v11  ;;  %v911_v31 = vadd.f32 %v2251_v27, %v904_v28 }
 0x37a   : > { %v912_v33 = vpack.c.bf16 %v911_v31, %v911_v31  ;;  %v1049_v34 = vmul.f32 %v2250_v25, %v1042_v30 }
 0x37c   : > { %2336 = vmatmul.mubr.msk.bf16.vlgmr.msra.gmra.mrb[0].mxu1 %vm883_vm0, %v912_v33  ;;  %v1056_v36 = vadd.f32 %v2251_v27, %v1049_v34 }
 0x37d   : > { %2340 = vmatpush3.bf16.msra.mxu1 %v2654_v32  ;;  %2343 = vmatprep.mubr.msk.bf16.mxu1 %vm3341_vm1, %v3340_v16 }
 0x37e   : > { %2341 = vmatprep.subr.bf16.mxu1 %v3340_v16  ;;  %v1057_v37 = vpack.c.bf16 %v1056_v36, %v1056_v36 }
 0x381   : > { %2342 = vmatpush3.bf16.msra.mxu1 %v2655_v35 }
 0x382   : > { %2353 = vmatprep.subr.bf16.mxu1 %v3340_v16 }
 0x384   : > { %2344 = vmatmul.mubr.msk.bf16.vlgmr.msra.gmra.mrb[4].mxu1 %vm883_vm0, %v1057_v37 }
 0x385   : > { %2355 = vmatprep.mubr.msk.bf16.mxu1 %vm3341_vm1, %v3340_v16 }
 0x44f   : > { %v973_v39 = vpop.f32.mrb[0].mxu1 }
 0x450   : > { %v4004_v40 = vadd.f32 %v2252_v38, %v973_v39  ;;  %v2337_v41 = vpop.f32.mrb[1].mxu1 }
 0x451   : > { %v976_v42 = vpop.f32.mrb[2].mxu1 }
 0x452   : > { %979 = vxpose.xlu0.b32.start.end [1/1] (short) (narrow) %v4004_v40, 32  ;;  %v2338_v43 = vpop.f32.mrb[3].mxu1  ;;  %v2297_v37 = vpack.c.bf16 %v4004_v40, %v4004_v40 }
 0x457   : > { %v1118_v45 = vpop.f32.mrb[4].mxu1 }
 0x458   : > { %v1119_v46 = vadd.f32 %v2259_v44, %v1118_v45  ;;  %v2345_v47 = vpop.f32.mrb[5].mxu1 }
 0x459   : > { %v1121_v48 = vpop.f32.mrb[6].mxu1 }
 0x45a   : > { %v1124_v49 = vpack.c.bf16 %v1119_v46, %v1119_v46  ;;  %v2346_v50 = vpop.f32.mrb[7].mxu1 }
 0x45c   : > { %1249 = vrot.lane.b32.xlu1 %v1124_v49, %s3342_s1 }
 0x460   : > { %1375 = vrot.lane.b32.xlu1 %v1124_v49, %s3343_s17 }
 0x464   : > { %1499 = vrot.lane.b32.xlu1 %v1124_v49, %s3344_s24 }
 0x4ce   : > { %v1250_v0 = vpop.permute.xlu1 %1249 }
 0x4d2   : > { %v995_v51 = vpop.trf.xlu0  ;;  %v1376_v5 = vpop.permute.xlu1 %1375 }
 0x4d6   : > { %v996_v52 = vpop.trf.xlu0  ;;  %v1500_v6 = vpop.permute.xlu1 %1499 }
 0x4d7   : > { %v1011_v53 = vpack.c.bf16 %v996_v52, %v995_v51 }
 0x4d9   : > { %1014 = vst.msk [vmem:[#allocation2] sm:$0xff] %vm1013_vm2, %v1011_v53 }
 0x4da   : > { %v997_v54 = vpop.trf.xlu0 }
 0x4de   : > { %v998_v55 = vpop.trf.xlu0 }
 0x4df   : > { %v1012_v56 = vpack.c.bf16 %v998_v55, %v997_v54 }
 0x4e0   : > { %v1128_v57 = vld [vmem:[#allocation2] sm:$0xf]  ;;  %v1247_v58 = vld [vmem:[#allocation2] sm:$0xf0] }
 0x4e1   : > { %v1134_v59 = vsel %vm1132_vm3, %v1128_v57, 0  ;;  %1015 = vst.msk [vmem:[#allocation2 + $0x8] sm:$0xff] %vm1013_vm2, %v1012_v56  ;;  %v1252_v60 = vrot.slane %v1247_v58, 4 }
 0x4e2   : > { %2348 = vmatpush3.bf16.msra.mxu0 %v1134_v59 }
 0x4e3   : > { %2359 = vmatprep.subr.bf16.mxu0 %v3340_v16  ;;  %v1257_v61 = vsel %vm1132_vm3, %v1252_v60, 0 }
 0x4e5   : > { %2350 = vmatmul.mubr.msk.bf16.vlgmr.msra.gmra.mrb[0].mxu0 %vm1013_vm2, %v1124_v49 }
 0x4e6   : > { %2360 = vmatpush3.bf16.msra.mxu0 %v1257_v61  ;;  %2361 = vmatprep.mubr.msk.bf16.mxu0 %vm3341_vm1, %v3340_v16 }
 0x4e7   : > { %2371 = vmatprep.subr.bf16.mxu0 %v3340_v16 }
 0x4e8   : > { %v1374_v62 = vld [vmem:[#allocation2 + $0x8] sm:$0xf]  ;;  %v1498_v2 = vld [vmem:[#allocation2 + $0x8] sm:$0xf0] }
 0x4e9   : > { %v1381_v63 = vsel %vm1132_vm3, %v1374_v62, 0  ;;  %v1502_v3 = vrot.slane %v1498_v2, 4 }
 0x4eb   : > { %v1507_v4 = vsel %vm1132_vm3, %v1502_v3, 0 }
 0x4ed   : > { %2362 = vmatmul.mubr.msk.bf16.vlgmr.msra.gmra.mrb[4].mxu0 %vm1013_vm2, %v1250_v0 }
 0x4ee   : > { %2372 = vmatpush3.bf16.msra.mxu0 %v1381_v63  ;;  %2373 = vmatprep.mubr.msk.bf16.mxu0 %vm3341_vm1, %v3340_v16 }
 0x4ef   : > { %2383 = vmatprep.subr.bf16.mxu0 %v3340_v16 }
 0x4f5   : > { %2374 = vmatmul.mubr.msk.bf16.vlgmr.msra.gmra.mrb[8].mxu0 %vm1013_vm2, %v1376_v5 }
 0x4f6   : > { %2384 = vmatpush3.bf16.msra.mxu0 %v1507_v4  ;;  %2385 = vmatprep.mubr.msk.bf16.mxu0 %vm3341_vm1, %v3340_v16  ;;  %v1195_v4 = vld [vmem:[#allocation5] sm:$0xff] }
 0x4f7   : > { %2395 = vmatprep.subr.bf16.mxu0 %v3340_v16 }
 0x4fd   : > { %2386 = vmatmul.mubr.msk.bf16.vlgmr.msra.gmra.mrb[12].mxu0 %vm1013_vm2, %v1500_v6 }
 0x4fe   : > { %2399 = vmatprep.mubr.msk.bf16.mxu0 %vm3341_vm1, %v3340_v16 }
 0x5b8   : > { %v1170_v7 = vpop.f32.mrb[0].mxu0 }
 0x5b9   : > { %v1176_v9 = vmul.f32 0.35355338, %v1170_v7  ;;  %v2351_v10 = vpop.f32.mrb[1].mxu0 }
 0x5ba   : > { %v1173_v11 = vpop.f32.mrb[2].mxu0 }
 0x5bb   : > { %v2352_v12 = vpop.f32.mrb[3].mxu0  ;;  %v1183_v13 = vadd.f32 %v2264_v8, %v1176_v9 }
 0x5bd   : > { %v1184_v14 = vsel %vm1013_vm2, %v1183_v13, -inf }
 0x5be   : > { %1185 = vmax.xlane.f32.xlu1 %v1184_v14 }
 0x5c0   : > { %v1293_v15 = vpop.f32.mrb[4].mxu0 }
 0x5c1   : > { %v1299_v17 = vmul.f32 0.35355338, %v1293_v15  ;;  %v2363_v18 = vpop.f32.mrb[5].mxu0 }
 0x5c2   : > { %v1296_v19 = vpop.f32.mrb[6].mxu0 }
 0x5c3   : > { %v2364_v20 = vpop.f32.mrb[7].mxu0  ;;  %v1300_v21 = vadd.f32 %v2264_v8, %v1299_v17 }
 0x5c5   : > { %v1301_v22 = vsel %vm1013_vm2, %v1300_v21, -inf }
 0x5c6   : > { %1302 = vmax.xlane.f32.xlu0 %v1301_v22 }
 0x5c8   : > { %v1417_v23 = vpop.f32.mrb[8].mxu0 }
 0x5c9   : > { %v1423_v24 = vmul.f32 0.35355338, %v1417_v23  ;;  %v2375_v25 = vpop.f32.mrb[9].mxu0 }
 0x5ca   : > { %v1420_v26 = vpop.f32.mrb[10].mxu0 }
 0x5cb   : > { %v2376_v27 = vpop.f32.mrb[11].mxu0  ;;  %v1424_v28 = vadd.f32 %v2264_v8, %v1423_v24 }
 0x5cd   : > { %v1425_v29 = vsel %vm1013_vm2, %v1424_v28, -inf }
 0x5ce   : > { %1426 = vmax.xlane.f32.xlu1 %v1425_v29 }
 0x5d0   : > { %v1543_v30 = vpop.f32.mrb[12].mxu0 }
 0x5d1   : > { %v1549_v31 = vmul.f32 0.35355338, %v1543_v30  ;;  %v2387_v32 = vpop.f32.mrb[13].mxu0 }
 0x5d2   : > { %v1546_v33 = vpop.f32.mrb[14].mxu0 }
 0x5d3   : > { %v2388_v34 = vpop.f32.mrb[15].mxu0  ;;  %v1550_v35 = vadd.f32 %v2264_v8, %v1549_v31 }
 0x5d5   : > { %v1551_v36 = vsel %vm1013_vm2, %v1550_v35, -inf }
 0x5d6   : > { %1552 = vmax.xlane.f32.xlu1 %v1551_v36 }
 0x5e7   : > { %1020 = vrot.lane.b32.xlu1 %v2297_v37, %s3345_s11 }
 0x64b   : > { %v1186_v38 = vpop.xlane.xlu1 %1185 }
 0x64c   : > { %v1187_v39 = vsub.f32 %v1183_v13, %v1186_v38 }
 0x64e   : > { %v1188_v41 = vmul.f32 1.442695, %v1187_v39 }
 0x650   : > { %2671 = vpow2.f32 %v1188_v41 }
 0x653   : > { %v1303_v42 = vpop.xlane.xlu0 %1302 }
 0x654   : > { %v1304_v43 = vsub.f32 %v1300_v21, %v1303_v42 }
 0x656   : > { %v1305_v44 = vmul.f32 1.442695, %v1304_v43 }
 0x658   : > { %2673 = vpow2.f32 %v1305_v44  ;;  %v2659_v44 = vld [vmem:[#allocation21] sm:$0xff]  }
 0x659   : > { %2396 = vmatpush3.bf16.msra.mxu0 %v2659_v44 }
 0x65a   : > { %v2672_v45 = vpop.eup %2671  ;;  %2397 = vmatprep.subr.bf16.mxu0 %v3340_v16 }
 0x65b   : > { %v1190_v46 = vsel %vm1013_vm2, %v2672_v45, 0.0  ;;  %v1427_v47 = vpop.xlane.xlu1 %1426 }
 0x65c   : > { %1191 = vadd.xlane.f32.xlu1 %v1190_v46  ;;  %v1428_v55 = vsub.f32 %v1424_v28, %v1427_v47 }
 0x65e   : > { %v1429_v56 = vmul.f32 1.442695, %v1428_v55 }
 0x660   : > { %2675 = vpow2.f32 %v1429_v56 }
 0x662   : > { %v2674_v48 = vpop.eup %2673 }
 0x663   : > { %v1553_v49 = vpop.xlane.xlu1 %1552  ;;  %v1307_v50 = vsel %vm1013_vm2, %v2674_v48, 0.0 }
 0x664   : > { %1308 = vadd.xlane.f32.xlu0 %v1307_v50  ;;  %v1554_v57 = vsub.f32 %v1550_v35, %v1553_v49 }
 0x666   : > { %v1555_v58 = vmul.f32 1.442695, %v1554_v57 }
 0x667   : > { %v1021_v40 = vpop.permute.xlu1 %1020 }
 0x668   : > { %1024 = vst.msk [vmem:[#allocation3] sm:$0xf] %vm1023_vm4, %v1021_v40  ;;  %2677 = vpow2.f32 %v1555_v58  ;;  %v2275_v58 = vld [vmem:[#allocation23] ss:$0 sm:$0xff] }
 0x66a   : > { %v2676_v59 = vpop.eup %2675 }
 0x66b   : > { %v1431_v60 = vsel %vm1013_vm2, %v2676_v59, 0.0 }
 0x66f   : > { %v1198_v51 = vld [vmem:[#allocation3] sm:$0xf] }
 0x670   : > { %v2656_v52 = vld [vmem:[#allocation3] ss:$0 sps:$4 sm:$0xff]   ;;  %v1204_v53 = vsel %vm1132_vm3, %v1198_v51, 0 }
 0x671   : > { %2354 = vmatpush3.bf16.msra.mxu1 %v1204_v53  ;;  %1444 = vrot.lane.b32.xlu1 %v2656_v52, %s3343_s17  ;;  %v2657_v54 = vld [vmem:[#allocation3] ss:$0 sps:$4 sm:$0xff]   ;;  %s3173_s17 = scalar_lea.vmem %s1923_s6, 64 }
 0x672   : > { %2365 = vmatprep.subr.bf16.mxu1 %v3340_v16  ;;  %v2678_v61 = vpop.eup %2677  ;;  %v2658_v63 = vld [vmem:[#allocation3] ss:$0 sps:$4 sm:$0xff]   ;;  %p3174_p6 = scmp.ne.s32.totalorder %s1923_s6, %s3173_s17 }
 0x673   : > { %v1557_v62 = vsel %vm1013_vm2, %v2678_v61, 0.0 }
 0x674   : > { %p3175_p12 = pnand %p3174_p6, %p4291_p3 }
 0x676   : > { %p3176_p13 = pneg %p3175_p12 }
 0x67a   : > { %1320 = vrot.lane.b32.xlu0 %v2657_v54, %s3342_s1  ;;  %s1894_s1 = scalar_lea.sflag [#allocation35], %s3933_s13 }
 0x699   : > { %1432 = vadd.xlane.f32.xlu0 %v1431_v60 }
 0x69d   : > { %1558 = vadd.xlane.f32.xlu0 %v1557_v62 }
 0x6b3   : > { %1570 = vrot.lane.b32.xlu0 %v2658_v63, %s3344_s24  ;;  %s3349_s24 = smov [#allocation34]  }
 0x6b4   : > { %s3177_s11 = sshll.u32 %s3349_s24, 4  ;;  %s3178_s11 = int_to_ptr.vmem [resolvable:$false] %s3177_s11 }
 0x6b5   : > { %p3180_p11 = scmp.lt.s32.totalorder %s1923_s6, %s3178_s11 }
 0x6e9   : > { %v1192_v0 = vpop.xlane.xlu1 %1191 }
 0x6ea   : > { %2679 = vrcp.f32 %v1192_v0 }
 0x6ed   : > { %v1445_v12 = vpop.permute.xlu1 %1444 }
 0x6ee   : > { %v1450_v15 = vsel %vm1132_vm3, %v1445_v12, 0 }
 0x6f1   : > { %v1309_v2 = vpop.xlane.xlu0 %1308 }
 0x6f2   : > { %2681 = vrcp.f32 %v1309_v2 }
 0x6f4   : > { %v2680_v3 = vpop.eup %2679 }
 0x6f5   : > { %v1194_v5 = vmul.f32 %v2680_v3, %v2672_v45  ;;  %v1321_v6 = vpop.permute.xlu0 %1320  ;;  %v2660_v45 = vld [vmem:[#allocation21 + $0x8] sm:$0xff]  }
 0x6f6   : > { %v1326_v9 = vsel %vm1132_vm3, %v1321_v6, 0  ;;  %2398 = vmatpush3.bf16.msra.mxu0 %v2660_v45 }
 0x6f7   : > { %v1196_v7 = vadd.f32 %v1195_v4, %v1194_v5  ;;  %v1199_v8 = vpack.c.bf16 %v1194_v5, %v1194_v5  ;;  %2411 = vmatprep.subr.bf16.mxu0 %v3340_v16 }
 0x6f9   : > { %1197 = vst.msk [vmem:[#allocation5] sm:$0xff] %vm1013_vm2, %v1196_v7  ;;  %2356 = vmatmul.mubr.msk.bf16.vlgmr.msra.gmra.mrb[8].mxu1 %vm1013_vm2, %v1199_v8  ;;  %v2661_v8 = vld [vmem:[#allocation27] sm:$0xff]  }
 0x6fa   : > { %2366 = vmatpush3.bf16.msra.mxu1 %v1326_v9  ;;  %2367 = vmatprep.mubr.msk.bf16.mxu1 %vm3341_vm1, %v3340_v16  ;;  %v2662_v9 = vld [vmem:[#allocation27 + $0x8] sm:$0xff]  }
 0x6fb   : > { %2377 = vmatprep.subr.bf16.mxu1 %v3340_v16 }
 0x6fc   : > { %v2682_v10 = vpop.eup %2681 }
 0x6fd   : > { %v1311_v11 = vmul.f32 %v2682_v10, %v2674_v48 }
 0x6ff   : > { %v1316_v13 = vpack.c.bf16 %v1311_v11, %v1311_v11 }
 0x700   : > { %v1312_v14 = vld [vmem:[#allocation5] sm:$0xff] }
 0x701   : > { %v1313_v17 = vadd.f32 %v1312_v14, %v1311_v11  ;;  %2368 = vmatmul.mubr.msk.bf16.vlgmr.msra.gmra.mrb[12].mxu1 %vm1013_vm2, %v1316_v13  ;;  %v2279_v13 = vld [vmem:[#allocation24] ss:$0 sm:$0xff] }
 0x702   : > { %2378 = vmatpush3.bf16.msra.mxu1 %v1450_v15  ;;  %2379 = vmatprep.mubr.msk.bf16.mxu1 %vm3341_vm1, %v3340_v16  ;;  %v2280_v15 = vld [vmem:[#allocation26] ss:$0 sm:$0xff] }
 0x703   : > { %1314 = vst.msk [vmem:[#allocation5] sm:$0xff] %vm1013_vm2, %v1313_v17  ;;  %2389 = vmatprep.subr.bf16.mxu1 %v3340_v16 }
 0x70a   : > { %v1436_v22 = vld [vmem:[#allocation5] sm:$0xff] }
 0x726   : > { %v1433_v18 = vpop.xlane.xlu0 %1432 }
 0x727   : > { %2683 = vrcp.f32 %v1433_v18 }
 0x72a   : > { %v1559_v19 = vpop.xlane.xlu0 %1558 }
 0x72b   : > { %2685 = vrcp.f32 %v1559_v19 }
 0x72e   : > { %v1571_v23 = vpop.permute.xlu0 %1570 }
 0x72f   : > { %v1576_v27 = vsel %vm1132_vm3, %v1571_v23, 0  ;;  %v2666_v23 = vld [vmem:[#allocation30 + $0x18] sm:$0xff]  }
 0x731   : > { %v2684_v20 = vpop.eup %2683 }
 0x732   : > { %v1435_v21 = vmul.f32 %v2684_v20, %v2676_v59  ;;  %v2663_v20 = vld [vmem:[#allocation30] sm:$0xff]  }
 0x734   : > { %v1437_v24 = vadd.f32 %v1436_v22, %v1435_v21  ;;  %v1440_v25 = vpack.c.bf16 %v1435_v21, %v1435_v21  ;;  %v2664_v21 = vld [vmem:[#allocation30 + $0x8] sm:$0xff]   ;;  %v2665_v22 = vld [vmem:[#allocation30 + $0x10] sm:$0xff]  }
 0x735   : > { %v2686_v26 = vpop.eup %2685 }
 0x736   : > { %1438 = vst.msk [vmem:[#allocation5] sm:$0xff] %vm1013_vm2, %v1437_v24  ;;  %2380 = vmatmul.mubr.msk.bf16.vlgmr.msra.gmra.mrb[16].mxu1 %vm1013_vm2, %v1440_v25  ;;  %v1561_v28 = vmul.f32 %v2686_v26, %v2678_v61  ;;  %v2281_v24 = vld [vmem:[#allocation29] ss:$0 sm:$0xff] }
 0x737   : > { %2390 = vmatpush3.bf16.msra.mxu1 %v1576_v27  ;;  %2391 = vmatprep.mubr.msk.bf16.mxu1 %vm3341_vm1, %v3340_v16 }
 0x738   : > { %2403 = vmatprep.subr.bf16.mxu1 %v3340_v16  ;;  %v1566_v29 = vpack.c.bf16 %v1561_v28, %v1561_v28 }
 0x73d   : > { %v1562_v30 = vld [vmem:[#allocation5] sm:$0xff] }
 0x73e   : > { %v1563_v31 = vadd.f32 %v1562_v30, %v1561_v28  ;;  %2392 = vmatmul.mubr.msk.bf16.vlgmr.msra.gmra.mrb[20].mxu1 %vm1013_vm2, %v1566_v29 }
 0x73f   : > { %2407 = vmatprep.mubr.msk.bf16.mxu1 %vm3341_vm1, %v3340_v16  ;;  %2404 = vmatpush3.bf16.msra.mxu1 %v2661_v8 }
 0x740   : > { %1564 = vst.msk [vmem:[#allocation5] sm:$0xff] %vm1013_vm2, %v1563_v31  ;;  %2405 = vmatprep.subr.bf16.mxu1 %v3340_v16 }
 0x743   : > { %2406 = vmatpush3.bf16.msra.mxu1 %v2662_v9 }
 0x747   : > { %v1624_v32 = vld [vmem:[#allocation5] sm:$0xff] }
 0x748   : > { %v1625_v33 = vmul.f32 0.25, %v1624_v32 }
 0x74a   : > { %v1626_v34 = vpack.c.bf16 %v1625_v33, %v1625_v33 }
 0x74c   : > { %1628 = vst.msk [vmem:[%s4075_s22] sm:$0xf] %vm1627_vm5, %v1626_v34 }
 0x7cc   : > { %v1240_v35 = vpop.f32.mrb[8].mxu1 }
 0x7cd   : > { %1246 = vst.msk [vmem:[#allocation4] sm:$0xff] %vm1013_vm2, %v1240_v35  ;;  %v2357_v36 = vpop.f32.mrb[9].mxu1 }
 0x7ce   : > { %v1243_v37 = vpop.f32.mrb[10].mxu1 }
 0x7cf   : > { %v2358_v38 = vpop.f32.mrb[11].mxu1 }
 0x7d4   : > { %v1362_v39 = vpop.f32.mrb[12].mxu1 }
 0x7d5   : > { %1369 = vrot.lane.b32.xlu1 %v1362_v39, %s3346_s12  ;;  %v2369_v41 = vpop.f32.mrb[13].mxu1  ;;  %s3179_s12 = scalar_lea.vmem %s3178_s11, 128 }
 0x7d6   : > { %v1365_v42 = vpop.f32.mrb[14].mxu1  ;;  %p3181_p8 = scmp.lt.s32.totalorder %s3179_s12, %s3173_s17 }
 0x7d7   : > { %v2370_v43 = vpop.f32.mrb[15].mxu1 }
 0x7d8   : > { %p3182_p7 = por %p3181_p8, %p3180_p11 }
 0x7da   : > { %p3183_p1 = pnand %p3182_p7, %p3176_p13 }
 0x809   : > { %v1486_v46 = vpop.f32.mrb[16].mxu1 }
 0x80a   : > { %1493 = vrot.lane.b32.xlu0 %v1486_v46, %s3347_s26  ;;  %v2381_v47 = vpop.f32.mrb[17].mxu1 }
 0x80b   : > { %v1489_v48 = vpop.f32.mrb[18].mxu1 }
 0x80c   : > { %v2382_v49 = vpop.f32.mrb[19].mxu1 }
 0x811   : > { %v1612_v50 = vpop.f32.mrb[20].mxu1 }
 0x812   : > { %1619 = vrot.lane.b32.xlu1 %v1612_v50, %s3348_s15  ;;  %v2393_v40 = vpop.f32.mrb[21].mxu1 }
 0x813   : > { %v1615_v51 = vpop.f32.mrb[22].mxu1 }
 0x814   : > { %v2394_v52 = vpop.f32.mrb[23].mxu1 }
 0x847   : > { %v1370_v53 = vpop.permute.xlu1 %1369 }
 0x848   : > { %1373 = vst.msk [vmem:[#allocation4] sm:$0xff] %vm1372_vm6, %v1370_v53 }
 0x87c   : > { %v1494_v54 = vpop.permute.xlu0 %1493 }
 0x87d   : > { %1497 = vst.msk [vmem:[#allocation4] sm:$0xff] %vm1496_vm7, %v1494_v54 }
 0x884   : > { %v1620_v55 = vpop.permute.xlu1 %1619 }
 0x885   : > { %1623 = vst.msk [vmem:[#allocation4] sm:$0xff] %vm1622_vm8, %v1620_v55 }
 0x88c   : > { %v1629_v56 = vld [vmem:[#allocation4] sm:$0xff] }
 0x88d   : > { %v1630_v57 = vpack.c.bf16 %v1629_v56, %v1629_v56 }
 0x88f   : > { %2400 = vmatmul.mubr.msk.bf16.vlgmr.msra.gmra.mrb[16].mxu0 %vm883_vm0, %v1630_v57 }
 0x890   : > { %2419 = vmatprep.mubr.msk.bf16.mxu0 %vm3341_vm1, %v3340_v16  ;;  %2412 = vmatpush3.bf16.msra.mxu0 %v2663_v20 }
 0x891   : > { %2413 = vmatprep.subr.bf16.mxu0 %v3340_v16 }
 0x894   : > { %2414 = vmatpush3.bf16.msra.mxu0 %v2664_v21 }
 0x895   : > { %2415 = vmatprep.subr.bf16.mxu0 %v3340_v16 }
 0x898   : > { %2416 = vmatpush3.bf16.msra.mxu0 %v2665_v22 }
 0x899   : > { %2417 = vmatprep.subr.bf16.mxu0 %v3340_v16 }
 0x89c   : > { %2418 = vmatpush3.bf16.msra.mxu0 %v2666_v23 }
 0x962   : > { %v1691_v59 = vpop.f32.mrb[16].mxu0 }
 0x963   : > { %v1692_v60 = vadd.f32 %v2275_v58, %v1691_v59  ;;  %v2401_v61 = vpop.f32.mrb[17].mxu0 }
 0x964   : > { %v1694_v62 = vpop.f32.mrb[18].mxu0 }
 0x965   : > { %v2402_v63 = vpop.f32.mrb[19].mxu0  ;;  %v1697_v0 = vadd.f32 %v1692_v60, %v3980_v1 }
 0x967   : > { %v1700_v2 = vsel %vm883_vm0, %v1697_v0, 0.0 }
 0x968   : > { %1701 = vadd.xlane.f32.xlu0 %v1700_v2 }
 0x9f5   : > { %v1702_v3 = vpop.xlane.xlu0 %1701 }
 0x9f6   : > { %v1703_v4 = vmul.f32 0.03125, %v1702_v3 }
 0x9f8   : > { %v1704_v5 = vsub.f32 %v1697_v0, %v1703_v4 }
 0x9fa   : > { %v1705_v6 = vmul.f32 %v1704_v5, %v1704_v5 }
 0x9fc   : > { %v1706_v7 = vsel %vm883_vm0, %v1705_v6, 0.0 }
 0x9fd   : > { %1707 = vadd.xlane.f32.xlu1 %v1706_v7 }
 0xa8a   : > { %v1708_v10 = vpop.xlane.xlu1 %1707 }
 0xa8b   : > { %v1709_v11 = vmul.f32 0.03125, %v1708_v10 }
 0xa8d   : > { %v1710_v12 = vadd.f32 1e-05, %v1709_v11 }
 0xa8f   : > { %2687 = vrsqrt.f32 %v1710_v12 }
 0xa99   : > { %v2688_v1 = vpop.eup %2687 }
 0xa9a   : > { %v1712_v14 = vmul.f32 %v2688_v1, %v1704_v5 }
 0xa9c   : > { %v1719_v17 = vmul.f32 %v2279_v13, %v1712_v14 }
 0xa9e   : > { %v1726_v18 = vadd.f32 %v2280_v15, %v1719_v17 }
 0xaa0   : > { %v1727_v19 = vpack.c.bf16 %v1726_v18, %v1726_v18 }
 0xaa2   : > { %2408 = vmatmul.mubr.msk.bf16.vlgmr.msra.gmra.mrb[24].mxu1 %vm883_vm0, %v1727_v19 }
 0xb75   : > { %v1788_v25 = vpop.f32.mrb[24].mxu1 }
 0xb76   : > { %v1789_v26 = vadd.f32 %v2281_v24, %v1788_v25  ;;  %v2409_v27 = vpop.f32.mrb[25].mxu1 }
 0xb77   : > { %v1791_v28 = vpop.f32.mrb[26].mxu1 }
 0xb78   : > { %v1795_v29 = vmul.f32 0.044715, %v1789_v26  ;;  %v2410_v30 = vpop.f32.mrb[27].mxu1  ;;  %v1794_v36 = vmul.f32 0.5, %v1789_v26 }
 0xb7a   : > { %v1796_v31 = vmul.f32 %v1795_v29, %v1789_v26 }
 0xb7c   : > { %v1797_v32 = vmul.f32 %v1796_v31, %v1789_v26 }
 0xb7e   : > { %v1798_v33 = vadd.f32 %v1797_v32, %v1789_v26 }
 0xb80   : > { %v1799_v34 = vmul.f32 0.7978846, %v1798_v33 }
 0xb82   : > { %2689 = vtanh.f32 %v1799_v34 }
 0xb8c   : > { %v2690_v35 = vpop.eup %2689 }
 0xb8d   : > { %v1801_v16 = vadd.f32 1.0, %v2690_v35 }
 0xb8f   : > { %v1802_v37 = vmul.f32 %v1801_v16, %v1794_v36 }
 0xb91   : > { %v1803_v38 = vpack.c.bf16 %v1802_v37, %v1802_v37 }
 0xb93   : > { %2420 = vmatmul.mubr.msk.bf16.vlgmr.msra.gmra.mrb[20].mxu0 %vm1843_vm9, %v1803_v38 }
 0xb94   : > { %3186 = shalt.err (!%p3183_p1)
}
 0xb95   : > { %s3187_s22 = scalar_lea.hbm %s4096_s16, 64  ;;  %s3191_s7 = scalar_lea.hbm %s4290_s8, 128 }
 0xb96   : > { %p3188_p4 = scmp.ne.s32.totalorder %s4096_s16, %s3187_s22  ;;  %p3192_p9 = scmp.lt.u32.totalorder %s4096_s16, %s4290_s8 }
 0xb97   : > { %p3193_p0 = scmp.lt.u32.totalorder %s3191_s7, %s3187_s22  ;;  %p3195_p6 = scmp.lt.u32.totalorder %s3187_s22, %s4096_s16 }
 0xb98   : > { %p3189_p10 = pnand %p3188_p4, %p4291_p3 }
 0xb99   : > { %p3194_p2 = por %p3193_p0, %p3192_p9 }
 0xb9a   : > { %p3190_p5 = pneg %p3189_p10 }
 0xb9b   : > { %p3196_p12 = por %p3195_p6, %p3194_p2 }
 0xb9d   : > { %p3197_p13 = pnand %p3196_p12, %p3190_p5 }
 0xb9f   : > { %3200 = shalt.err (!%p3197_p13)
}
 0xba0   : > { %2486 = dma.vmem_to_hbm [thread:$0]  (%p4291_p3), %s1923_s6, 64, %s4096_s16, %s1894_s1   ;;  %v2285_v39 = vld [vmem:[#allocation32] ss:$0 sm:$0xff] }
 0xba1   : > { %s2293_s30 = sshll.u32 %s4288_s20, 7  ;;  %s866_s17 = scalar_lea.vmem [#allocation33], %s2232_s3 }
 0xba2   : > { %s1908_s24 = sshll.u32 %s866_s17, 4  ;;  %s4292_s22 = sld [smem:[#allocation67_spill]]  ;;  %s4125_s24 = int_to_ptr.vmem [resolvable:$true] %s1908_s24 }
 0xba3   : > { %s1889_s20 = scalar_lea.sflag [#allocation8], %s3933_s13  ;;  %s3201_s3 = scalar_lea.vmem %s4125_s24, 128 }
 0xba4   : > { %p3202_p11 = scmp.ne.s32.totalorder %s4125_s24, %s3201_s3  ;;  %s3350_s16 = smov [#allocation33]  }
 0xba5   : > { %s3205_s6 = sshll.u32 %s3350_s16, 4  ;;  %s3206_s6 = int_to_ptr.vmem [resolvable:$false] %s3205_s6 }
 0xba6   : > { %p3203_p8 = pnand %p3202_p11, %p4291_p3  ;;  %s3207_s1 = scalar_lea.vmem %s3206_s6, 256 }
 0xba7   : > { %p3208_p1 = scmp.lt.s32.totalorder %s4125_s24, %s3206_s6  ;;  %p3209_p4 = scmp.lt.s32.totalorder %s3207_s1, %s3201_s3 }
 0xba8   : > { %s4123_s26 = scalar_lea.hbm %s4292_s22, %s2293_s30  ;;  %p3204_p7 = pneg %p3203_p8 }
 0xba9   : > { %p3210_p10 = por %p3209_p4, %p3208_p1 }
 0xbab   : > { %p3211_p5 = pnand %p3210_p10, %p3204_p7 }
 0xc66   : > { %v1881_v41 = vpop.f32.mrb[20].mxu0 }
 0xc67   : > { %v1882_v42 = vadd.f32 %v2285_v39, %v1881_v41  ;;  %v2421_v43 = vpop.f32.mrb[21].mxu0 }
 0xc68   : > { %v1884_v44 = vpop.f32.mrb[22].mxu0 }
 0xc69   : > { %v2422_v45 = vpop.f32.mrb[23].mxu0  ;;  %1887 = vst.msk [vmem:[%s866_s17] sm:$0xff] %vm883_vm0, %v1882_v42 }
 0xc6a   : > { %3214 = shalt.err (!%p3211_p5)
}
 0xc6b   : > { %s3215_s13 = scalar_lea.hbm %s4123_s26, 128  ;;  %s3219_s2 = scalar_lea.hbm %s4292_s22, 256 }
 0xc6c   : > { %p3216_p9 = scmp.ne.s32.totalorder %s4123_s26, %s3215_s13  ;;  %p3220_p6 = scmp.lt.u32.totalorder %s4123_s26, %s4292_s22 }
 0xc6d   : > { %p3221_p12 = scmp.lt.u32.totalorder %s3219_s2, %s3215_s13  ;;  %p3223_p11 = scmp.lt.u32.totalorder %s3215_s13, %s4123_s26 }
 0xc6e   : > { %p3217_p0 = pnand %p3216_p9, %p4291_p3 }
 0xc6f   : > { %p3222_p13 = por %p3221_p12, %p3220_p6 }
 0xc70   : > { %p3218_p2 = pneg %p3217_p0 }
 0xc71   : > { %p3224_p8 = por %p3223_p11, %p3222_p13 }
 0xc73   : > { %p3225_p7 = pnand %p3224_p8, %p3218_p2 }
 0xc75   : > { %3228 = shalt.err (!%p3225_p7)
}
 0xc76   : > { %2485 = dma.vmem_to_hbm [thread:$0]  (%p4291_p3), %s4125_s24, 128, %s4123_s26, %s1889_s20  }
 0xc77 PF: > { %s1934_s17 = sand.u32 1, %s3299_s27   ;;  %p4293_p1 = scmp.ne.s32.totalorder %s4253_s18, 0 }
 0xc78   : > { %p4294_p4 = scmp.ge.s32.totalorder %s3319_s19, 2  ;;  %s1935_s11 = scalar_lea.sflag [#allocation8], %s1934_s17 }
 0xc7a   : > { %p2543_p10 = pnand %p4294_p4, %p4293_p1 }
 0xc7c   : > { %3290 = dma.done.wait (!%p2543_p10), %s1935_s11, 128  }
 0xc7d   : > { %3292 = vsyncadd (!%p2543_p10), %s1935_s11, 4294967168  ;;  %s1944_s12 = scalar_lea.sflag [#allocation35], %s1934_s17 }
 0xc7e   : > { %3294 = dma.done.wait (!%p2543_p10), %s1944_s12, 64  }
 0xc7f   : > { %3296 = vsyncadd (!%p2543_p10), %s1944_s12, 4294967232  ;;  %s48_s19 = sadd.s32 1, %s3319_s19   ;;  %s4295_s14 = sld [smem:[#allocation49_spill]] }
 0xc80   : > { %p45_p5 = scmp.ge.s32.totalorder %s48_s19, 4   ;;  %s4296_s27 = smov %s3303_s28 }
 0xc81   : > { %s4297_s28 = smov %s3307_s29  ;;  %s4298_s29 = smov %s3677_s21 }
 0xc82   : > { %s4299_s30 = smov %s3315_s0  ;;  %47 = sbr.rel (!%p45_p5) target bundleno = 37 (0x25), region = 234 }
 0xc85   : > { %s4300_s0 = smov %s4295_s14 }
 0xc89   :  { %1949 = vsyncpa [#allocation7], 1 }
 0xc8a   :  { %1951 = vsyncpa [#allocation7 + $0x1], 1 }
 0xc8b   :  { %1952 = vsyncpa [#allocation10], 1 }
 0xc8c   :  { %1954 = vsyncpa [#allocation10 + $0x1], 1 }
 0xc8d   :  { %1955 = vsyncpa [#allocation13], 1 }
 0xc8e   :  { %1956 = vsyncpa [#allocation16], 1 }
 0xc8f   :  { %1957 = vsyncpa [#allocation19], 1 }
 0xc90   :  { %1958 = vsyncpa [#allocation22], 1 }
 0xc91   :  { %1959 = vsyncpa [#allocation25], 1 }
 0xc92   :  { %1960 = vsyncpa [#allocation28], 1 }
 0xc93   :  { %1961 = vsyncpa [#allocation31], 1 }
 0xc94   :  { %1962 = vsyncpa [#allocation8], 1 }
 0xc95   :  { %1964 = vsyncpa [#allocation8 + $0x1], 1 }
 0xc96   :  { %1965 = vsyncpa [#allocation35], 1 }
 0xc97   :  { %1967 = vsyncpa [#allocation35 + $0x1], 1 }

</bundles_post_ra>
